<compile_context>
chip_gen: v7x
topology: tpu7x:2x2x1
jax: 0.10.0
libtpu: 0.0.40
codegen_flags: <defaults>
</compile_context>

<pallas_src>
import jax
import jax.numpy as jnp
from jax.experimental import pallas as pl
from jax.experimental.pallas import tpu as pltpu

EPS = 1e-5

# ------------------------- packed-vector row indices -------------------------
# vecs is (17, 384) f32; each row zero-padded to 384 lanes:
#   0: [b1|b4]   1: [g1|g4]   2: [be1|be4]
#   3: [b2|b5]   4: [g2|g5]   5: [be2|be5]
#   6: [b3|b6]
#   7: b7   8: g7   9: be7
#  10: b8  11: g8  12: be8
#  13: b9  14: g9  15: be9
#  16: b10


# --------------------------------- kernel -----------------------------------

def mlp_kernel(ge_ref, d_ref, wa_ref, wb_ref, wc_ref, vec_ref, out_ref, x_ref):
    vecs = vec_ref[...]                       # (17, 384) f32, resident once

    def vec(row, n):
        return vecs[row:row + 1, :n]          # (1, n) f32, static slice

    def linear(x, w):
        # bf16 operands on the MXU, f32 accumulate.
        return jnp.dot(x.astype(jnp.bfloat16), w,
                       preferred_element_type=jnp.float32)

    def bn_relu(y, g_row, be_row, n):
        # Training-mode BatchNorm1d (biased variance) + ReLU.
        # Stats + gamma/beta folded into (1,n) rows so the (B,n) block only
        # does sub + fma + max; rsqrt goes to the EUP slot (free vs. VALU).
        inv_b = 1.0 / y.shape[0]
        mean = jnp.sum(y, axis=0, keepdims=True) * inv_b
        yc = y - mean                                           # centered
        var = jnp.sum(yc * yc, axis=0, keepdims=True) * inv_b   # two-pass var
        scale = vec(g_row, n) * jax.lax.rsqrt(var + EPS)        # (1, n)
        return jnp.maximum(yc * scale + vec(be_row, n), 0.0)

    # In-kernel input packing: x = [ge | d | 0] in bf16, shape (B, 384).
    x_ref[...] = jnp.zeros_like(x_ref)
    x_ref[:, 0:256] = ge_ref[...].astype(jnp.bfloat16)
    x_ref[:, 256:256 + d_ref.shape[1]] = d_ref[...].astype(jnp.bfloat16)

    # Stage 1: block-diag(w1, w4) -> both branches' layer 1, one 384-wide BN.
    h = linear(x_ref[...], wa_ref[0:384, :]) + vec(0, 384)
    h = bn_relu(h, 1, 2, 384)
    # Stage 2: block-diag(w2, w5).
    h = linear(h, wa_ref[384:768, :]) + vec(3, 384)
    h = bn_relu(h, 4, 5, 384)
    # Stage 3: block-diag(w3, w6); its output == torch.cat([ge, d], dim=1),
    # already lane-dense -> no concatenate needed.
    c = jnp.maximum(linear(h, wb_ref[0:384, :]) + vec(6, 128), 0.0)   # (B, 128)
    # Combine layers 1-3.
    c = bn_relu(linear(c, wb_ref[384:512, :]) + vec(7, 128), 8, 9, 128)     # w7
    c = bn_relu(linear(c, wb_ref[512:640, :]) + vec(10, 128), 11, 12, 128)  # w8
    c = bn_relu(linear(c, wc_ref[0:128, :]) + vec(13, 64), 14, 15, 64)      # w9
    # Combine layer 4: Linear(64, 1)  (w10 zero-padded to 64 output lanes).
    y = linear(c, wc_ref[128:192, :])
    # (B,1) output kept for module fidelity; a lane-dense output would need a
    # wrapper-side slice (an extra XLA launch), which costs more at small B.
    out_ref[...] = (y[:, 0:1] + vecs[16:17, 0:1]).astype(out_ref.dtype)


# --------------------------------- wrapper -----------------------------------

@jax.jit
def mlp_forward(ge, d, packed):
    wa, wb, wc, vecs = packed
    batch = ge.shape[0]

    flops = 2 * batch * (384 * 384 * 2 + 384 * 128 + 128 * 128 * 2
                         + 128 * 64 + 64 * 64)
    bytes_accessed = ((wa.size + wb.size + wc.size) * 2 + vecs.size * 4
                      + (ge.size + d.size) * 4 + batch * 4)
    # 5 BN stages -> rsqrt per feature: 384 + 384 + 128 + 128 + 64.
    cost = pl.CostEstimate(flops=flops, transcendentals=1088,
                           bytes_accessed=bytes_accessed)

    vmem = pl.BlockSpec(memory_space=pltpu.MemorySpace.VMEM)
    return pl.pallas_call(
        mlp_kernel,
        out_shape=jax.ShapeDtypeStruct((batch, 1), jnp.float32),
        in_specs=[vmem] * 6,
        out_specs=vmem,
        scratch_shapes=[pltpu.VMEM((batch, 384), jnp.bfloat16)],
        cost_estimate=cost,
        compiler_params=pltpu.CompilerParams(
            # batch-aware, capped below v7x's 64 MiB physical VMEM.
            vmem_limit_bytes=min(48 * 1024 * 1024,
                                 16 * 1024 * 1024 + batch * 16 * 1024)),
    )(ge, d, wa, wb, wc, vecs)


# ------------------------- deterministic param init --------------------------

def _init_linear(key, fan_in, fan_out):
    """torch.nn.Linear default init; W returned as (in, out), b as (out,)."""
    kw, kb = jax.random.split(key)
    bound = 1.0 / (float(fan_in) ** 0.5)
    w = jax.random.uniform(kw, (fan_in, fan_out), jnp.float32, -bound, bound)
    b = jax.random.uniform(kb, (fan_out,), jnp.float32, -bound, bound)
    return w, b


def make_raw_params(seed=0):
    keys = jax.random.split(jax.random.PRNGKey(seed), 10)
    dims = [(256, 256), (256, 256), (256, 64), (60, 128), (128, 128),
            (128, 64), (128, 128), (128, 128), (128, 64), (64, 1)]
    p = {}
    for i, (fi, fo) in enumerate(dims):
        w, b = _init_linear(keys[i], fi, fo)
        p[f"w{i + 1}"] = w
        p[f"b{i + 1}"] = b
    return p


def _pad_row(v, width=384):
    return jnp.zeros((1, width), jnp.float32).at[:, :v.shape[-1]].set(
        v.reshape(1, -1))


def pack_params(p):
    # block-diagonal fused stage weights (zero blocks contribute nothing)
    W1 = jnp.zeros((384, 384), jnp.float32)
    W1 = W1.at[0:256, 0:256].set(p["w1"]).at[256:316, 256:384].set(p["w4"])
    W2 = jnp.zeros((384, 384), jnp.float32)
    W2 = W2.at[0:256, 0:256].set(p["w2"]).at[256:384, 256:384].set(p["w5"])
    W3 = jnp.zeros((384, 128), jnp.float32)
    W3 = W3.at[0:256, 0:64].set(p["w3"]).at[256:384, 64:128].set(p["w6"])
    W10 = jnp.zeros((64, 64), jnp.float32).at[:, 0:1].set(p["w10"])

    # packed bf16 weight slabs, grouped by output lane width
    wa = jnp.concatenate([W1, W2], axis=0).astype(jnp.bfloat16)              # (768, 384)
    wb = jnp.concatenate([W3, p["w7"], p["w8"]], axis=0).astype(jnp.bfloat16)  # (640, 128)
    wc = jnp.concatenate([p["w9"], W10], axis=0).astype(jnp.bfloat16)        # (192, 64)

    ones = lambda n: jnp.ones((n,), jnp.float32)
    zeros = lambda n: jnp.zeros((n,), jnp.float32)
    rows = [
        jnp.concatenate([p["b1"], p["b4"]]), ones(384), zeros(384),   # stage 1
        jnp.concatenate([p["b2"], p["b5"]]), ones(384), zeros(384),   # stage 2
        jnp.concatenate([p["b3"], p["b6"]]),                          # stage 3
        p["b7"], ones(128), zeros(128),                               # combine 1
        p["b8"], ones(128), zeros(128),                               # combine 2
        p["b9"], ones(64), zeros(64),                                 # combine 3
        p["b10"],                                                     # combine 4
    ]
    vecs = jnp.concatenate([_pad_row(r) for r in rows], axis=0)       # (17, 384)
    return wa, wb, wc, vecs


# ------------------------------ f32 reference --------------------------------

@jax.jit
def mlp_reference(ge, d, p):
    def bn(y):  # fresh BatchNorm1d: gamma=1, beta=0, training-mode batch stats
        mean = jnp.mean(y, axis=0, keepdims=True)
        var = jnp.mean((y - mean) ** 2, axis=0, keepdims=True)
        return (y - mean) * jax.lax.rsqrt(var + EPS)

    lin = lambda x, w, b: x @ w + b
    relu = lambda x: jnp.maximum(x, 0.0)
    g = relu(bn(lin(ge, p["w1"], p["b1"])))
    g = relu(bn(lin(g, p["w2"], p["b2"])))
    g = relu(lin(g, p["w3"], p["b3"]))
    dd = relu(bn(lin(d, p["w4"], p["b4"])))
    dd = relu(bn(lin(dd, p["w5"], p["b5"])))
    dd = relu(lin(dd, p["w6"], p["b6"]))
    c = jnp.concatenate([g, dd], axis=1)
    c = relu(bn(lin(c, p["w7"], p["b7"])))
    c = relu(bn(lin(c, p["w8"], p["b8"])))
    c = relu(bn(lin(c, p["w9"], p["b9"])))
    return lin(c, p["w10"], p["b10"])


# ---------------------------------- main ------------------------------------

if __name__ == "__main__":
    key = jax.random.PRNGKey(0)
    k_ge, k_d = jax.random.split(key)

    batch = 8
    ge_latent = jax.random.normal(k_ge, (batch, 256), jnp.float32)
    d_latent = jax.random.normal(k_d, (batch, 60), jnp.float32)

    raw = make_raw_params(seed=0)
    packed = pack_params(raw)

    out = mlp_forward(ge_latent, d_latent, packed)
    jax.block_until_ready(out)
    assert out.shape == (batch, 1), out.shape
    assert bool(jnp.all(jnp.isfinite(out)))

    # Loose tolerance: kernel uses bf16 MXU operands vs. the f32 reference.
    ref = mlp_reference(ge_latent, d_latent, raw)
    err = float(jnp.max(jnp.abs(out - ref)))
    assert err < 0.25, f"max abs err vs f32 reference: {err}"

    print("KERNEL_OK")
</pallas_src>

<mosaic_0001>
module attributes {stable_mosaic.version = 11 : i64} {
  func.func @mlp_kernel(%arg0: memref<8x256xf32, #tpu.memory_space<vmem>>, %arg1: memref<8x60xf32, #tpu.memory_space<vmem>>, %arg2: memref<768x384xbf16, #tpu.memory_space<vmem>>, %arg3: memref<640x128xbf16, #tpu.memory_space<vmem>>, %arg4: memref<192x64xbf16, #tpu.memory_space<vmem>>, %arg5: memref<17x384xf32, #tpu.memory_space<vmem>>, %arg6: memref<8x1xf32, #tpu.memory_space<vmem>>, %arg7: memref<8x384xbf16, #tpu.memory_space<vmem>>) attributes {dimension_semantics = [], scalar_prefetch = 0 : i64, scratch_operands = 1 : i64, tpu.core_type = #tpu.core_type<tc>} {
    %c0 = arith.constant 0 : index
    %c0_0 = arith.constant 0 : index
    %0 = vector.load %arg5[%c0, %c0_0] : memref<17x384xf32, #tpu.memory_space<vmem>>, vector<17x384xf32>
    %cst = arith.constant 0.000000e+00 : bf16
    %1 = vector.broadcast %cst : bf16 to vector<8x384xbf16>
    %c0_1 = arith.constant 0 : index
    %c0_2 = arith.constant 0 : index
    %2 = vector.load %arg7[%c0_1, %c0_2] : memref<8x384xbf16, #tpu.memory_space<vmem>>, vector<8x384xbf16>
    tpu.vector_store %arg7[%c0_1, %c0_2], %1 {strides = array<i32>} : memref<8x384xbf16, #tpu.memory_space<vmem>>, vector<8x384xbf16>,
    %c0_3 = arith.constant 0 : index
    %c0_4 = arith.constant 0 : index
    %3 = vector.load %arg0[%c0_3, %c0_4] : memref<8x256xf32, #tpu.memory_space<vmem>>, vector<8x256xf32>
    %4 = arith.truncf %3 : vector<8x256xf32> to vector<8x256xbf16>
    %c0_5 = arith.constant 0 : index
    %c0_6 = arith.constant 0 : index
    %5 = vector.load %arg7[%c0_5, %c0_6] : memref<8x384xbf16, #tpu.memory_space<vmem>>, vector<8x256xbf16>
    tpu.vector_store %arg7[%c0_5, %c0_6], %4 {strides = array<i32>} : memref<8x384xbf16, #tpu.memory_space<vmem>>, vector<8x256xbf16>,
    %c0_7 = arith.constant 0 : index
    %c0_8 = arith.constant 0 : index
    %6 = vector.load %arg1[%c0_7, %c0_8] : memref<8x60xf32, #tpu.memory_space<vmem>>, vector<8x60xf32>
    %7 = arith.truncf %6 : vector<8x60xf32> to vector<8x60xbf16>
    %c0_9 = arith.constant 0 : index
    %c256 = arith.constant 256 : index
    %8 = vector.load %arg7[%c0_9, %c256] : memref<8x384xbf16, #tpu.memory_space<vmem>>, vector<8x60xbf16>
    tpu.vector_store %arg7[%c0_9, %c256], %7 {strides = array<i32>} : memref<8x384xbf16, #tpu.memory_space<vmem>>, vector<8x60xbf16>,
    %c0_10 = arith.constant 0 : index
    %c0_11 = arith.constant 0 : index
    %9 = vector.load %arg7[%c0_10, %c0_11] : memref<8x384xbf16, #tpu.memory_space<vmem>>, vector<8x384xbf16>
    %c0_12 = arith.constant 0 : index
    %c0_13 = arith.constant 0 : index
    %10 = vector.load %arg2[%c0_12, %c0_13] : memref<768x384xbf16, #tpu.memory_space<vmem>>, vector<384x384xbf16>
    %cst_14 = arith.constant dense<0.000000e+00> : vector<8x384xf32>
    %11 = tpu.matmul %9, %10, %cst_14 {dimension_numbers = #tpu.dot_dimension_numbers<[1], [0], [0], [1], [0, 0, 1, 1], [], []>} : vector<8x384xbf16>, vector<384x384xbf16>, vector<8x384xf32> -> vector<8x384xf32>
    %12 = vector.extract_strided_slice %0 {offsets = [0, 0], sizes = [1, 384], strides = [1, 1]} : vector<17x384xf32> to vector<1x384xf32>
    %13 = vector.broadcast %12 : vector<1x384xf32> to vector<8x384xf32>
    %14 = arith.addf %11, %13 : vector<8x384xf32>
    %cst_15 = arith.constant dense<0.000000e+00> : vector<384xf32>
    %15 = vector.multi_reduction <add>, %14, %cst_15 [0] : vector<8x384xf32> to vector<384xf32>
    %16 = vector.shape_cast %15 : vector<384xf32> to vector<1x384xf32>
    %cst_16 = arith.constant 1.250000e-01 : f32
    %17 = vector.broadcast %cst_16 : f32 to vector<1x384xf32>
    %18 = arith.mulf %16, %17 : vector<1x384xf32>
    %19 = vector.broadcast %18 : vector<1x384xf32> to vector<8x384xf32>
    %20 = arith.subf %14, %19 : vector<8x384xf32>
    %21 = arith.mulf %20, %20 : vector<8x384xf32>
    %cst_17 = arith.constant dense<0.000000e+00> : vector<384xf32>
    %22 = vector.multi_reduction <add>, %21, %cst_17 [0] : vector<8x384xf32> to vector<384xf32>
    %23 = vector.shape_cast %22 : vector<384xf32> to vector<1x384xf32>
    %cst_18 = arith.constant 1.250000e-01 : f32
    %24 = vector.broadcast %cst_18 : f32 to vector<1x384xf32>
    %25 = arith.mulf %23, %24 : vector<1x384xf32>
    %26 = vector.extract_strided_slice %0 {offsets = [1, 0], sizes = [1, 384], strides = [1, 1]} : vector<17x384xf32> to vector<1x384xf32>
    %cst_19 = arith.constant 9.99999974E-6 : f32
    %27 = vector.broadcast %cst_19 : f32 to vector<1x384xf32>
    %28 = arith.addf %25, %27 : vector<1x384xf32>
    %29 = math.rsqrt %28 : vector<1x384xf32>
    %30 = arith.mulf %26, %29 : vector<1x384xf32>
    %31 = vector.broadcast %30 : vector<1x384xf32> to vector<8x384xf32>
    %32 = arith.mulf %20, %31 : vector<8x384xf32>
    %33 = vector.extract_strided_slice %0 {offsets = [2, 0], sizes = [1, 384], strides = [1, 1]} : vector<17x384xf32> to vector<1x384xf32>
    %34 = vector.broadcast %33 : vector<1x384xf32> to vector<8x384xf32>
    %35 = arith.addf %32, %34 : vector<8x384xf32>
    %cst_20 = arith.constant 0.000000e+00 : f32
    %36 = vector.broadcast %cst_20 : f32 to vector<8x384xf32>
    %37 = arith.maximumf %35, %36 : vector<8x384xf32>
    %c384 = arith.constant 384 : index
    %c0_21 = arith.constant 0 : index
    %38 = vector.load %arg2[%c384, %c0_21] : memref<768x384xbf16, #tpu.memory_space<vmem>>, vector<384x384xbf16>
    %39 = arith.truncf %37 : vector<8x384xf32> to vector<8x384xbf16>
    %cst_22 = arith.constant dense<0.000000e+00> : vector<8x384xf32>
    %40 = tpu.matmul %39, %38, %cst_22 {dimension_numbers = #tpu.dot_dimension_numbers<[1], [0], [0], [1], [0, 0, 1, 1], [], []>} : vector<8x384xbf16>, vector<384x384xbf16>, vector<8x384xf32> -> vector<8x384xf32>
    %41 = vector.extract_strided_slice %0 {offsets = [3, 0], sizes = [1, 384], strides = [1, 1]} : vector<17x384xf32> to vector<1x384xf32>
    %42 = vector.broadcast %41 : vector<1x384xf32> to vector<8x384xf32>
    %43 = arith.addf %40, %42 : vector<8x384xf32>
    %cst_23 = arith.constant dense<0.000000e+00> : vector<384xf32>
    %44 = vector.multi_reduction <add>, %43, %cst_23 [0] : vector<8x384xf32> to vector<384xf32>
    %45 = vector.shape_cast %44 : vector<384xf32> to vector<1x384xf32>
    %cst_24 = arith.constant 1.250000e-01 : f32
    %46 = vector.broadcast %cst_24 : f32 to vector<1x384xf32>
    %47 = arith.mulf %45, %46 : vector<1x384xf32>
    %48 = vector.broadcast %47 : vector<1x384xf32> to vector<8x384xf32>
    %49 = arith.subf %43, %48 : vector<8x384xf32>
    %50 = arith.mulf %49, %49 : vector<8x384xf32>
    %cst_25 = arith.constant dense<0.000000e+00> : vector<384xf32>
    %51 = vector.multi_reduction <add>, %50, %cst_25 [0] : vector<8x384xf32> to vector<384xf32>
    %52 = vector.shape_cast %51 : vector<384xf32> to vector<1x384xf32>
    %cst_26 = arith.constant 1.250000e-01 : f32
    %53 = vector.broadcast %cst_26 : f32 to vector<1x384xf32>
    %54 = arith.mulf %52, %53 : vector<1x384xf32>
    %55 = vector.extract_strided_slice %0 {offsets = [4, 0], sizes = [1, 384], strides = [1, 1]} : vector<17x384xf32> to vector<1x384xf32>
    %cst_27 = arith.constant 9.99999974E-6 : f32
    %56 = vector.broadcast %cst_27 : f32 to vector<1x384xf32>
    %57 = arith.addf %54, %56 : vector<1x384xf32>
    %58 = math.rsqrt %57 : vector<1x384xf32>
    %59 = arith.mulf %55, %58 : vector<1x384xf32>
    %60 = vector.broadcast %59 : vector<1x384xf32> to vector<8x384xf32>
    %61 = arith.mulf %49, %60 : vector<8x384xf32>
    %62 = vector.extract_strided_slice %0 {offsets = [5, 0], sizes = [1, 384], strides = [1, 1]} : vector<17x384xf32> to vector<1x384xf32>
    %63 = vector.broadcast %62 : vector<1x384xf32> to vector<8x384xf32>
    %64 = arith.addf %61, %63 : vector<8x384xf32>
    %cst_28 = arith.constant 0.000000e+00 : f32
    %65 = vector.broadcast %cst_28 : f32 to vector<8x384xf32>
    %66 = arith.maximumf %64, %65 : vector<8x384xf32>
    %c0_29 = arith.constant 0 : index
    %c0_30 = arith.constant 0 : index
    %67 = vector.load %arg3[%c0_29, %c0_30] : memref<640x128xbf16, #tpu.memory_space<vmem>>, vector<384x128xbf16>
    %68 = arith.truncf %66 : vector<8x384xf32> to vector<8x384xbf16>
    %cst_31 = arith.constant dense<0.000000e+00> : vector<8x128xf32>
    %69 = tpu.matmul %68, %67, %cst_31 {dimension_numbers = #tpu.dot_dimension_numbers<[1], [0], [0], [1], [0, 0, 1, 1], [], []>} : vector<8x384xbf16>, vector<384x128xbf16>, vector<8x128xf32> -> vector<8x128xf32>
    %70 = vector.extract_strided_slice %0 {offsets = [6, 0], sizes = [1, 128], strides = [1, 1]} : vector<17x384xf32> to vector<1x128xf32>
    %71 = vector.broadcast %70 : vector<1x128xf32> to vector<8x128xf32>
    %72 = arith.addf %69, %71 : vector<8x128xf32>
    %cst_32 = arith.constant 0.000000e+00 : f32
    %73 = vector.broadcast %cst_32 : f32 to vector<8x128xf32>
    %74 = arith.maximumf %72, %73 : vector<8x128xf32>
    %c384_33 = arith.constant 384 : index
    %c0_34 = arith.constant 0 : index
    %75 = vector.load %arg3[%c384_33, %c0_34] : memref<640x128xbf16, #tpu.memory_space<vmem>>, vector<128x128xbf16>
    %76 = arith.truncf %74 : vector<8x128xf32> to vector<8x128xbf16>
    %cst_35 = arith.constant dense<0.000000e+00> : vector<8x128xf32>
    %77 = tpu.matmul %76, %75, %cst_35 {dimension_numbers = #tpu.dot_dimension_numbers<[1], [0], [0], [1], [0, 0, 1, 1], [], []>} : vector<8x128xbf16>, vector<128x128xbf16>, vector<8x128xf32> -> vector<8x128xf32>
    %78 = vector.extract_strided_slice %0 {offsets = [7, 0], sizes = [1, 128], strides = [1, 1]} : vector<17x384xf32> to vector<1x128xf32>
    %79 = vector.broadcast %78 : vector<1x128xf32> to vector<8x128xf32>
    %80 = arith.addf %77, %79 : vector<8x128xf32>
    %cst_36 = arith.constant dense<0.000000e+00> : vector<128xf32>
    %81 = vector.multi_reduction <add>, %80, %cst_36 [0] : vector<8x128xf32> to vector<128xf32>
    %82 = vector.shape_cast %81 : vector<128xf32> to vector<1x128xf32>
    %cst_37 = arith.constant 1.250000e-01 : f32
    %83 = vector.broadcast %cst_37 : f32 to vector<1x128xf32>
    %84 = arith.mulf %82, %83 : vector<1x128xf32>
    %85 = vector.broadcast %84 : vector<1x128xf32> to vector<8x128xf32>
    %86 = arith.subf %80, %85 : vector<8x128xf32>
    %87 = arith.mulf %86, %86 : vector<8x128xf32>
    %cst_38 = arith.constant dense<0.000000e+00> : vector<128xf32>
    %88 = vector.multi_reduction <add>, %87, %cst_38 [0] : vector<8x128xf32> to vector<128xf32>
    %89 = vector.shape_cast %88 : vector<128xf32> to vector<1x128xf32>
    %cst_39 = arith.constant 1.250000e-01 : f32
    %90 = vector.broadcast %cst_39 : f32 to vector<1x128xf32>
    %91 = arith.mulf %89, %90 : vector<1x128xf32>
    %92 = vector.extract_strided_slice %0 {offsets = [8, 0], sizes = [1, 128], strides = [1, 1]} : vector<17x384xf32> to vector<1x128xf32>
    %cst_40 = arith.constant 9.99999974E-6 : f32
    %93 = vector.broadcast %cst_40 : f32 to vector<1x128xf32>
    %94 = arith.addf %91, %93 : vector<1x128xf32>
    %95 = math.rsqrt %94 : vector<1x128xf32>
    %96 = arith.mulf %92, %95 : vector<1x128xf32>
    %97 = vector.broadcast %96 : vector<1x128xf32> to vector<8x128xf32>
    %98 = arith.mulf %86, %97 : vector<8x128xf32>
    %99 = vector.extract_strided_slice %0 {offsets = [9, 0], sizes = [1, 128], strides = [1, 1]} : vector<17x384xf32> to vector<1x128xf32>
    %100 = vector.broadcast %99 : vector<1x128xf32> to vector<8x128xf32>
    %101 = arith.addf %98, %100 : vector<8x128xf32>
    %cst_41 = arith.constant 0.000000e+00 : f32
    %102 = vector.broadcast %cst_41 : f32 to vector<8x128xf32>
    %103 = arith.maximumf %101, %102 : vector<8x128xf32>
    %c512 = arith.constant 512 : index
    %c0_42 = arith.constant 0 : index
    %104 = vector.load %arg3[%c512, %c0_42] : memref<640x128xbf16, #tpu.memory_space<vmem>>, vector<128x128xbf16>
    %105 = arith.truncf %103 : vector<8x128xf32> to vector<8x128xbf16>
    %cst_43 = arith.constant dense<0.000000e+00> : vector<8x128xf32>
    %106 = tpu.matmul %105, %104, %cst_43 {dimension_numbers = #tpu.dot_dimension_numbers<[1], [0], [0], [1], [0, 0, 1, 1], [], []>} : vector<8x128xbf16>, vector<128x128xbf16>, vector<8x128xf32> -> vector<8x128xf32>
    %107 = vector.extract_strided_slice %0 {offsets = [10, 0], sizes = [1, 128], strides = [1, 1]} : vector<17x384xf32> to vector<1x128xf32>
    %108 = vector.broadcast %107 : vector<1x128xf32> to vector<8x128xf32>
    %109 = arith.addf %106, %108 : vector<8x128xf32>
    %cst_44 = arith.constant dense<0.000000e+00> : vector<128xf32>
    %110 = vector.multi_reduction <add>, %109, %cst_44 [0] : vector<8x128xf32> to vector<128xf32>
    %111 = vector.shape_cast %110 : vector<128xf32> to vector<1x128xf32>
    %cst_45 = arith.constant 1.250000e-01 : f32
    %112 = vector.broadcast %cst_45 : f32 to vector<1x128xf32>
    %113 = arith.mulf %111, %112 : vector<1x128xf32>
    %114 = vector.broadcast %113 : vector<1x128xf32> to vector<8x128xf32>
    %115 = arith.subf %109, %114 : vector<8x128xf32>
    %116 = arith.mulf %115, %115 : vector<8x128xf32>
    %cst_46 = arith.constant dense<0.000000e+00> : vector<128xf32>
    %117 = vector.multi_reduction <add>, %116, %cst_46 [0] : vector<8x128xf32> to vector<128xf32>
    %118 = vector.shape_cast %117 : vector<128xf32> to vector<1x128xf32>
    %cst_47 = arith.constant 1.250000e-01 : f32
    %119 = vector.broadcast %cst_47 : f32 to vector<1x128xf32>
    %120 = arith.mulf %118, %119 : vector<1x128xf32>
    %121 = vector.extract_strided_slice %0 {offsets = [11, 0], sizes = [1, 128], strides = [1, 1]} : vector<17x384xf32> to vector<1x128xf32>
    %cst_48 = arith.constant 9.99999974E-6 : f32
    %122 = vector.broadcast %cst_48 : f32 to vector<1x128xf32>
    %123 = arith.addf %120, %122 : vector<1x128xf32>
    %124 = math.rsqrt %123 : vector<1x128xf32>
    %125 = arith.mulf %121, %124 : vector<1x128xf32>
    %126 = vector.broadcast %125 : vector<1x128xf32> to vector<8x128xf32>
    %127 = arith.mulf %115, %126 : vector<8x128xf32>
    %128 = vector.extract_strided_slice %0 {offsets = [12, 0], sizes = [1, 128], strides = [1, 1]} : vector<17x384xf32> to vector<1x128xf32>
    %129 = vector.broadcast %128 : vector<1x128xf32> to vector<8x128xf32>
    %130 = arith.addf %127, %129 : vector<8x128xf32>
    %cst_49 = arith.constant 0.000000e+00 : f32
    %131 = vector.broadcast %cst_49 : f32 to vector<8x128xf32>
    %132 = arith.maximumf %130, %131 : vector<8x128xf32>
    %c0_50 = arith.constant 0 : index
    %c0_51 = arith.constant 0 : index
    %133 = vector.load %arg4[%c0_50, %c0_51] : memref<192x64xbf16, #tpu.memory_space<vmem>>, vector<128x64xbf16>
    %134 = arith.truncf %132 : vector<8x128xf32> to vector<8x128xbf16>
    %cst_52 = arith.constant dense<0.000000e+00> : vector<8x64xf32>
    %135 = tpu.matmul %134, %133, %cst_52 {dimension_numbers = #tpu.dot_dimension_numbers<[1], [0], [0], [1], [0, 0, 1, 1], [], []>} : vector<8x128xbf16>, vector<128x64xbf16>, vector<8x64xf32> -> vector<8x64xf32>
    %136 = vector.extract_strided_slice %0 {offsets = [13, 0], sizes = [1, 64], strides = [1, 1]} : vector<17x384xf32> to vector<1x64xf32>
    %137 = vector.broadcast %136 : vector<1x64xf32> to vector<8x64xf32>
    %138 = arith.addf %135, %137 : vector<8x64xf32>
    %cst_53 = arith.constant dense<0.000000e+00> : vector<64xf32>
    %139 = vector.multi_reduction <add>, %138, %cst_53 [0] : vector<8x64xf32> to vector<64xf32>
    %140 = vector.shape_cast %139 : vector<64xf32> to vector<1x64xf32>
    %cst_54 = arith.constant 1.250000e-01 : f32
    %141 = vector.broadcast %cst_54 : f32 to vector<1x64xf32>
    %142 = arith.mulf %140, %141 : vector<1x64xf32>
    %143 = vector.broadcast %142 : vector<1x64xf32> to vector<8x64xf32>
    %144 = arith.subf %138, %143 : vector<8x64xf32>
    %145 = arith.mulf %144, %144 : vector<8x64xf32>
    %cst_55 = arith.constant dense<0.000000e+00> : vector<64xf32>
    %146 = vector.multi_reduction <add>, %145, %cst_55 [0] : vector<8x64xf32> to vector<64xf32>
    %147 = vector.shape_cast %146 : vector<64xf32> to vector<1x64xf32>
    %cst_56 = arith.constant 1.250000e-01 : f32
    %148 = vector.broadcast %cst_56 : f32 to vector<1x64xf32>
    %149 = arith.mulf %147, %148 : vector<1x64xf32>
    %150 = vector.extract_strided_slice %0 {offsets = [14, 0], sizes = [1, 64], strides = [1, 1]} : vector<17x384xf32> to vector<1x64xf32>
    %cst_57 = arith.constant 9.99999974E-6 : f32
    %151 = vector.broadcast %cst_57 : f32 to vector<1x64xf32>
    %152 = arith.addf %149, %151 : vector<1x64xf32>
    %153 = math.rsqrt %152 : vector<1x64xf32>
    %154 = arith.mulf %150, %153 : vector<1x64xf32>
    %155 = vector.broadcast %154 : vector<1x64xf32> to vector<8x64xf32>
    %156 = arith.mulf %144, %155 : vector<8x64xf32>
    %157 = vector.extract_strided_slice %0 {offsets = [15, 0], sizes = [1, 64], strides = [1, 1]} : vector<17x384xf32> to vector<1x64xf32>
    %158 = vector.broadcast %157 : vector<1x64xf32> to vector<8x64xf32>
    %159 = arith.addf %156, %158 : vector<8x64xf32>
    %cst_58 = arith.constant 0.000000e+00 : f32
    %160 = vector.broadcast %cst_58 : f32 to vector<8x64xf32>
    %161 = arith.maximumf %159, %160 : vector<8x64xf32>
    %c128 = arith.constant 128 : index
    %c0_59 = arith.constant 0 : index
    %162 = vector.load %arg4[%c128, %c0_59] : memref<192x64xbf16, #tpu.memory_space<vmem>>, vector<64x64xbf16>
    %163 = arith.truncf %161 : vector<8x64xf32> to vector<8x64xbf16>
    %cst_60 = arith.constant dense<0.000000e+00> : vector<8x64xf32>
    %164 = tpu.matmul %163, %162, %cst_60 {dimension_numbers = #tpu.dot_dimension_numbers<[1], [0], [0], [1], [0, 0, 1, 1], [], []>} : vector<8x64xbf16>, vector<64x64xbf16>, vector<8x64xf32> -> vector<8x64xf32>
    %165 = vector.extract_strided_slice %164 {offsets = [0, 0], sizes = [8, 1], strides = [1, 1]} : vector<8x64xf32> to vector<8x1xf32>
    %166 = vector.extract_strided_slice %0 {offsets = [16, 0], sizes = [1, 1], strides = [1, 1]} : vector<17x384xf32> to vector<1x1xf32>
    %167 = vector.broadcast %166 : vector<1x1xf32> to vector<8x1xf32>
    %168 = arith.addf %165, %167 : vector<8x1xf32>
    %c0_61 = arith.constant 0 : index
    %c0_62 = arith.constant 0 : index
    %169 = vector.load %arg6[%c0_61, %c0_62] : memref<8x1xf32, #tpu.memory_space<vmem>>, vector<8x1xf32>
    tpu.vector_store %arg6[%c0_61, %c0_62], %168 {strides = array<i32>} : memref<8x1xf32, #tpu.memory_space<vmem>>, vector<8x1xf32>,
    return
  }
}

</mosaic_0001>

<bundles_post_ra>
// kernel: mlp_forward.1
= control target key start
LH: loop header
LB: loop body
LE: loop exit
PB: predicated region body
PF: predicated region fallthrough
CT: control target
= control target key end

     0   :  { %11 = vsyncpa [#allocation4], 0  ;;  %s3463_s0 = inlined_call_operand.vmem [shape: f32[8,256], index: 0, kind: input, shape index: {}]   ;;  %s3464_s1 = inlined_call_operand.vmem [shape: f32[8,60], index: 1, kind: input, shape index: {}]   ;;  %s3465_s2 = inlined_call_operand.hbm [shape: bf16[768,384], index: 2, kind: input, shape index: {}]   ;;  %s3466_s3 = inlined_call_operand.hbm [shape: bf16[640,128], index: 3, kind: input, shape index: {}]   ;;  %s3467_s4 = inlined_call_operand.vmem [shape: bf16[192,64], index: 4, kind: input, shape index: {}]   ;;  %s3468_s5 = inlined_call_operand.vmem [shape: f32[17,384], index: 5, kind: input, shape index: {}]   ;;  %s3469_s6 = inlined_call_operand.vmem [shape: f32[8,1], index: 6, kind: output, shape index: {}]  }
   0x1   :  { %12 = vsyncpa [#allocation6], 0  ;;  %s3161_s21 = smov [#allocation3]   ;;  %s3113_s25 = scalar_lea.hbm %s3465_s2, 18432 }
   0x2   :  { %s22_s22 = sshll.u32 %s3161_s21, 4  ;;  %p3114_p0 = scmp.ne.s32.totalorder %s3465_s2, %s3113_s25  ;;  %s23_s22 = int_to_ptr.vmem [resolvable:$true] %s22_s22 }
   0x3   :  { %p3117_p1 = scmp.lt.u32.totalorder %s3113_s25, %s3465_s2 }
   0x5   :  { %p3119_p2 = pnand %p3117_p1, %p3114_p0 }
   0x7   :  { %3122 = shalt.err (!%p3119_p2)
}
   0x8   :  { %s3123_s30 = scalar_lea.vmem %s23_s22, 18432  ;;  %p3128_p4 = scmp.lt.s32.totalorder %s23_s22, %s23_s22 }
   0x9   :  { %p3124_p3 = scmp.ne.s32.totalorder %s23_s22, %s3123_s30  ;;  %p3129_p5 = scmp.lt.s32.totalorder %s3123_s30, %s3123_s30 }
   0xb   :  { %p3130_p6 = por %p3129_p5, %p3128_p4 }
   0xd   :  { %p3131_p7 = pnand %p3130_p6, %p3124_p3 }
   0xf   :  { %3134 = shalt.err (!%p3131_p7)
}
  0x10   :  { %s3162_s7 = smov 192   ;;  %s3163_s8 = smov 12  }
  0x11   :  { %28 = dma.hbm_to_vmem [thread:$0]  %s3465_s2, 18432, %s23_s22, [#allocation4], %s3162_s7, %s3162_s7, %s3163_s8  }
  0x12   :  { %s3164_s11 = smov [#allocation5]   ;;  %s3135_s15 = scalar_lea.hbm %s3466_s3, 5120 }
  0x13   :  { %s34_s12 = sshll.u32 %s3164_s11, 4  ;;  %p3136_p8 = scmp.ne.s32.totalorder %s3466_s3, %s3135_s15  ;;  %s35_s12 = int_to_ptr.vmem [resolvable:$true] %s34_s12 }
  0x14   :  { %p3139_p9 = scmp.lt.u32.totalorder %s3135_s15, %s3466_s3 }
  0x16   :  { %p3141_p10 = pnand %p3139_p9, %p3136_p8 }
  0x18   :  { %3144 = shalt.err (!%p3141_p10)
}
  0x19   :  { %s3145_s20 = scalar_lea.vmem %s35_s12, 5120  ;;  %p3150_p12 = scmp.lt.s32.totalorder %s35_s12, %s35_s12 }
  0x1a   :  { %p3146_p11 = scmp.ne.s32.totalorder %s35_s12, %s3145_s20  ;;  %p3151_p13 = scmp.lt.s32.totalorder %s3145_s20, %s3145_s20 }
  0x1c   :  { %p3152_p0 = por %p3151_p13, %p3150_p12 }
  0x1e   :  { %p3153_p1 = pnand %p3152_p0, %p3146_p11 }
  0x20   :  { %3156 = shalt.err (!%p3153_p1)
}
  0x21   :  { %s3165_s2 = smov 64   ;;  %s3166_s21 = smov 4  }
  0x22   :  { %40 = dma.hbm_to_vmem [thread:$0]  %s3466_s3, 5120, %s35_s12, [#allocation6], %s3165_s2, %s3165_s2, %s3166_s21  }
  0x23   :  { %3157 = dma.done.wait [#allocation4], 18432  }
  0x24   :  { %3158 = vsyncadd [#allocation4], 4294948864 }
  0x25   :  { %3159 = dma.done.wait [#allocation6], 5120  }
  0x26   :  { %3160 = vsyncadd [#allocation6], 4294962176  ;;  %v3167_v0 = vmov 0   ;;  %v2848_v1 = vld [vmem:[#allocation3 + $0x4] ss:$12 sps:$4 sm:$0xff]   ;;  %v59_v32 = vld [vmem:[%s3463_s0] sm:$0xff] }
  0x27   :  { %58 = vst [vmem:[#allocation2 + $0x8] sm:$0xf] %v3167_v0  ;;  %v2850_v2 = vld [vmem:[#allocation3 + $0xc8] ss:$12 sps:$4 sm:$0xff]   ;;  %579 = vmatprep.subr.bf16.mxu0 %v2848_v1  ;;  %v2851_v3 = vld [vmem:[#allocation3] ss:$12 sps:$4 sm:$0xff]   ;;  %v3236_v38 = vpack.c.bf16 %v59_v32, %v59_v32 }
  0x28   :  { %2570 = vmatprep.subr.bf16.mxu1 %v2850_v2  ;;  %v2852_v4 = vld [vmem:[#allocation3 + $0x8] ss:$12 sps:$4 sm:$0xff]   ;;  %580 = vmatpush1.bf16.msra.mxu0 %v2851_v3  ;;  %v2855_v6 = vld [vmem:[#allocation3 + $0xe0] ss:$12 sps:$4 sm:$0xff]   ;;  %v2856_v7 = vld [vmem:[#allocation3 + $0x18] ss:$12 sps:$4 sm:$0xff]  }
  0x29   :  { %v2853_v5 = vld [vmem:[#allocation3 + $0x1c] ss:$12 sps:$4 sm:$0xff]   ;;  %2571 = vmatpush3.bf16.msra.mxu1 %v2852_v4  ;;  %v2857_v8 = vld [vmem:[#allocation3 + $0x20] ss:$12 sps:$4 sm:$0xff]   ;;  %v2860_v10 = vld [vmem:[#allocation3 + $0xf8] ss:$12 sps:$4 sm:$0xff]  }
  0x2a   :  { %581 = vmatprep.subr.bf16.mxu0 %v2853_v5  ;;  %2572 = vmatprep.subr.bf16.mxu1 %v2855_v6  ;;  %v2858_v9 = vld [vmem:[#allocation3 + $0x34] ss:$12 sps:$4 sm:$0xff]   ;;  %v2861_v11 = vld [vmem:[#allocation3 + $0x30] ss:$12 sps:$4 sm:$0xff]   ;;  %v2862_v12 = vld [vmem:[#allocation3 + $0x38] ss:$12 sps:$4 sm:$0xff]  }
  0x2b   :  { %v2863_v13 = vld [vmem:[#allocation3 + $0x4c] ss:$12 sps:$4 sm:$0xff]   ;;  %v2865_v14 = vld [vmem:[#allocation3 + $0x110] ss:$12 sps:$4 sm:$0xff]   ;;  %v2866_v15 = vld [vmem:[#allocation3 + $0x48] ss:$12 sps:$4 sm:$0xff]  }
  0x2c   :  { %582 = vmatpush1.bf16.msra.mxu0 %v2856_v7  ;;  %v2867_v16 = vld [vmem:[#allocation3 + $0x50] ss:$12 sps:$4 sm:$0xff]   ;;  %v2870_v18 = vld [vmem:[#allocation3 + $0x128] ss:$12 sps:$4 sm:$0xff]   ;;  %v2871_v19 = vld [vmem:[#allocation3 + $0x60] ss:$12 sps:$4 sm:$0xff]  }
  0x2d   :  { %2573 = vmatpush3.bf16.msra.mxu1 %v2857_v8  ;;  %583 = vmatprep.subr.bf16.mxu0 %v2858_v9  ;;  %v2868_v17 = vld [vmem:[#allocation3 + $0x64] ss:$12 sps:$4 sm:$0xff]   ;;  %v2872_v20 = vld [vmem:[#allocation3 + $0x68] ss:$12 sps:$4 sm:$0xff]   ;;  %v2875_v22 = vld [vmem:[#allocation3 + $0x140] ss:$12 sps:$4 sm:$0xff]  }
  0x2e   :  { %2574 = vmatprep.subr.bf16.mxu1 %v2860_v10  ;;  %v2873_v21 = vld [vmem:[#allocation3 + $0x7c] ss:$12 sps:$4 sm:$0xff]   ;;  %v2876_v23 = vld [vmem:[#allocation3 + $0x78] ss:$12 sps:$4 sm:$0xff]   ;;  %v2877_v24 = vld [vmem:[#allocation3 + $0x80] ss:$12 sps:$4 sm:$0xff]  }
  0x2f   :  { %v2878_v25 = vld [vmem:[#allocation3 + $0x94] ss:$12 sps:$4 sm:$0xff]   ;;  %v2880_v26 = vld [vmem:[#allocation3 + $0x158] ss:$12 sps:$4 sm:$0xff]   ;;  %v2881_v27 = vld [vmem:[#allocation3 + $0x90] ss:$12 sps:$4 sm:$0xff]  }
  0x30   :  { %584 = vmatpush1.bf16.msra.mxu0 %v2861_v11  ;;  %v2882_v28 = vld [vmem:[#allocation3 + $0x98] ss:$12 sps:$4 sm:$0xff]   ;;  %v2885_v30 = vld [vmem:[#allocation3 + $0x170] ss:$12 sps:$4 sm:$0xff]   ;;  %v2886_v31 = vld [vmem:[#allocation3 + $0xa8] ss:$12 sps:$4 sm:$0xff]  }
  0x31   :  { %2575 = vmatpush3.bf16.msra.mxu1 %v2862_v12  ;;  %585 = vmatprep.subr.bf16.mxu0 %v2863_v13  ;;  %v2883_v29 = vld [vmem:[#allocation3 + $0xac] ss:$12 sps:$4 sm:$0xff]   ;;  %v2887_v33 = vld [vmem:[#allocation3 + $0xb0] ss:$12 sps:$4 sm:$0xff]   ;;  %v2891_v39 = vld [vmem:[#allocation3 + $0x188] ss:$12 sps:$4 sm:$0xff]  }
  0x32   :  { %2576 = vmatprep.subr.bf16.mxu1 %v2865_v14  ;;  %v60_v34 = vld [vmem:[%s3463_s0 + $0x8] sm:$0xff]  ;;  %v2888_v35 = vld [vmem:[#allocation3 + $0xc4] ss:$12 sps:$4 sm:$0xff]   ;;  %v3168_v41 = vmov 0.0   ;;  %vm3169_vm0 = vmmov 0   ;;  %v70_v51 = vld [vmem:[%s3464_s1] sm:$0xff] }
  0x33   :  { %v3111_v36 = vpack.c.bf16 %v60_v34, %v60_v34  ;;  %v2890_v37 = vld [vmem:[#allocation3 + $0xc0] ss:$12 sps:$4 sm:$0xff]   ;;  %v2892_v40 = vld [vmem:[#allocation3 + $0xdc] ss:$12 sps:$4 sm:$0xff]   ;;  %v2894_v42 = vld [vmem:[#allocation3 + $0xd8] ss:$12 sps:$4 sm:$0xff]   ;;  %v71_v54 = vpack.c.bf16 %v70_v51, %v70_v51 }
  0x34   :  { %586 = vmatpush1.bf16.msra.mxu0 %v2866_v15  ;;  %v2895_v43 = vld [vmem:[#allocation3 + $0x1a0] ss:$12 sps:$4 sm:$0xff]   ;;  %v2898_v45 = vld [vmem:[#allocation3 + $0xf0] ss:$12 sps:$4 sm:$0xff]   ;;  %v2899_v46 = vld [vmem:[#allocation3 + $0x1b8] ss:$12 sps:$4 sm:$0xff]  }
  0x35   :  { %2577 = vmatpush3.bf16.msra.mxu1 %v2867_v16  ;;  %587 = vmatprep.subr.bf16.mxu0 %v2868_v17  ;;  %v2896_v44 = vld [vmem:[#allocation3 + $0xf4] ss:$12 sps:$4 sm:$0xff]   ;;  %v2900_v47 = vld [vmem:[#allocation3 + $0x10c] ss:$12 sps:$4 sm:$0xff]   ;;  %v2903_v49 = vld [vmem:[#allocation3 + $0x1d0] ss:$12 sps:$4 sm:$0xff]  }
  0x36   :  { %2578 = vmatprep.subr.bf16.mxu1 %v2870_v18  ;;  %693 = vmatprep.mubr.bf16.mxu1 %v3111_v36  ;;  %v2902_v48 = vld [vmem:[#allocation3 + $0x108] ss:$12 sps:$4 sm:$0xff]   ;;  %v2904_v50 = vld [vmem:[#allocation3 + $0x124] ss:$12 sps:$4 sm:$0xff]   ;;  %vm72_vm1 = vcmask 486400   ;;  %vm2245_vm2 = vcmask 523264  }
  0x37   :  { %611 = vmatprep.mubr.bf16.mxu0 %v3111_v36  ;;  %v2906_v52 = vld [vmem:[#allocation3 + $0x120] ss:$12 sps:$4 sm:$0xff]   ;;  %v2907_v53 = vld [vmem:[#allocation3 + $0x1e8] ss:$12 sps:$4 sm:$0xff]   ;;  %73 = vst.msk [vmem:[#allocation2 + $0x8] sm:$0xf] %vm72_vm1, %v71_v54 }
  0x38   :  { %588 = vmatpush1.bf16.msra.mxu0 %v2871_v19  ;;  %v2908_v55 = vld [vmem:[#allocation3 + $0x13c] ss:$12 sps:$4 sm:$0xff]   ;;  %v2910_v56 = vld [vmem:[#allocation3 + $0x138] ss:$12 sps:$4 sm:$0xff]   ;;  %v2911_v57 = vld [vmem:[#allocation3 + $0x200] ss:$12 sps:$4 sm:$0xff]  }
  0x39   :  { %2579 = vmatpush3.bf16.msra.mxu1 %v2872_v20  ;;  %589 = vmatprep.subr.bf16.mxu0 %v2873_v21  ;;  %v2912_v58 = vld [vmem:[#allocation3 + $0x154] ss:$12 sps:$4 sm:$0xff]   ;;  %v2914_v59 = vld [vmem:[#allocation3 + $0x150] ss:$12 sps:$4 sm:$0xff]   ;;  %v2915_v60 = vld [vmem:[#allocation3 + $0x218] ss:$12 sps:$4 sm:$0xff]  }
  0x3a   :  { %2580 = vmatprep.subr.bf16.mxu1 %v2875_v22  ;;  %v2916_v61 = vld [vmem:[#allocation3 + $0x16c] ss:$12 sps:$4 sm:$0xff]   ;;  %v2918_v62 = vld [vmem:[#allocation3 + $0x168] ss:$12 sps:$4 sm:$0xff]   ;;  %v2919_v63 = vld [vmem:[#allocation3 + $0x230] ss:$12 sps:$4 sm:$0xff]  }
  0x3b   :  { %v2922_v1 = vld [vmem:[#allocation3 + $0x184] ss:$12 sps:$4 sm:$0xff]   ;;  %v2920_v2 = vld [vmem:[#allocation3 + $0x180] ss:$12 sps:$4 sm:$0xff]   ;;  %v2926_v4 = vld [vmem:[#allocation3 + $0x19c] ss:$12 sps:$4 sm:$0xff]  }
  0x3c   :  { %590 = vmatpush1.bf16.msra.mxu0 %v2876_v23  ;;  %v2924_v5 = vld [vmem:[#allocation3 + $0x198] ss:$12 sps:$4 sm:$0xff]   ;;  %v2929_v6 = vld [vmem:[#allocation3 + $0x1b4] ss:$12 sps:$4 sm:$0xff]   ;;  %v2927_v7 = vld [vmem:[#allocation3 + $0x1b0] ss:$12 sps:$4 sm:$0xff]  }
  0x3d   :  { %2581 = vmatpush3.bf16.msra.mxu1 %v2877_v24  ;;  %591 = vmatprep.subr.bf16.mxu0 %v2878_v25  ;;  %v2932_v8 = vld [vmem:[#allocation3 + $0x1cc] ss:$12 sps:$4 sm:$0xff]   ;;  %v2930_v9 = vld [vmem:[#allocation3 + $0x1c8] ss:$12 sps:$4 sm:$0xff]   ;;  %v2935_v10 = vld [vmem:[#allocation3 + $0x1e4] ss:$12 sps:$4 sm:$0xff]  }
  0x3e   :  { %2582 = vmatprep.subr.bf16.mxu1 %v2880_v26  ;;  %v2923_v3 = vld [vmem:[#allocation2 + $0x8] ss:$0 sps:$4 sm:$0xff]   ;;  %v2933_v11 = vld [vmem:[#allocation3 + $0x1e0] ss:$12 sps:$4 sm:$0xff]   ;;  %v2936_v13 = vld [vmem:[#allocation3 + $0x1f8] ss:$12 sps:$4 sm:$0xff]  }
  0x3f   :  { %v2938_v12 = vld [vmem:[#allocation3 + $0x1fc] ss:$12 sps:$4 sm:$0xff]   ;;  %v2941_v14 = vld [vmem:[#allocation3 + $0x214] ss:$12 sps:$4 sm:$0xff]   ;;  %v2944_v16 = vld [vmem:[#allocation3 + $0x22c] ss:$12 sps:$4 sm:$0xff]  }
  0x40   :  { %592 = vmatpush1.bf16.msra.mxu0 %v2881_v27  ;;  %v2939_v15 = vld [vmem:[#allocation3 + $0x210] ss:$12 sps:$4 sm:$0xff]   ;;  %v2942_v17 = vld [vmem:[#allocation3 + $0x228] ss:$12 sps:$4 sm:$0xff]   ;;  %v2945_v19 = vld [vmem:[#allocation3 + $0x240] ss:$12 sps:$4 sm:$0xff]  }
  0x41   :  { %2583 = vmatpush3.bf16.msra.mxu1 %v2882_v28  ;;  %593 = vmatprep.subr.bf16.mxu0 %v2883_v29  ;;  %v2947_v18 = vld [vmem:[#allocation3 + $0x244] ss:$12 sps:$4 sm:$0xff]   ;;  %v2950_v20 = vld [vmem:[#allocation3 + $0x25c] ss:$12 sps:$4 sm:$0xff]   ;;  %v2953_v22 = vld [vmem:[#allocation3 + $0x274] ss:$12 sps:$4 sm:$0xff]  }
  0x42   :  { %2584 = vmatprep.subr.bf16.mxu1 %v2885_v30  ;;  %v2948_v21 = vld [vmem:[#allocation3 + $0x258] ss:$12 sps:$4 sm:$0xff]   ;;  %v2951_v23 = vld [vmem:[#allocation3 + $0x270] ss:$12 sps:$4 sm:$0xff]   ;;  %v2954_v25 = vld [vmem:[#allocation3 + $0x288] ss:$12 sps:$4 sm:$0xff]  }
  0x43   :  { %v2956_v24 = vld [vmem:[#allocation3 + $0x28c] ss:$12 sps:$4 sm:$0xff]   ;;  %v2959_v26 = vld [vmem:[#allocation3 + $0x2a4] ss:$12 sps:$4 sm:$0xff]   ;;  %v2962_v28 = vld [vmem:[#allocation3 + $0x2bc] ss:$12 sps:$4 sm:$0xff]  }
  0x44   :  { %594 = vmatpush1.bf16.msra.mxu0 %v2886_v31  ;;  %v2957_v27 = vld [vmem:[#allocation3 + $0x2a0] ss:$12 sps:$4 sm:$0xff]   ;;  %v2960_v29 = vld [vmem:[#allocation3 + $0x2b8] ss:$12 sps:$4 sm:$0xff]   ;;  %v2963_v31 = vld [vmem:[#allocation3 + $0x2d0] ss:$12 sps:$4 sm:$0xff]  }
  0x45   :  { %2585 = vmatpush3.bf16.msra.mxu1 %v2887_v33  ;;  %595 = vmatprep.subr.bf16.mxu0 %v2888_v35  ;;  %v2965_v30 = vld [vmem:[#allocation3 + $0x2d4] ss:$12 sps:$4 sm:$0xff]   ;;  %v2968_v32 = vld [vmem:[#allocation3 + $0x2ec] ss:$12 sps:$4 sm:$0xff]   ;;  %v2971_v34 = vld [vmem:[#allocation3 + $0x304] ss:$12 sps:$4 sm:$0xff]  }
  0x46   :  { %2695 = vmatprep.subr.bf16.mxu1 %v3168_v41  ;;  %v2966_v33 = vld [vmem:[#allocation3 + $0x2e8] ss:$12 sps:$4 sm:$0xff]   ;;  %v2969_v36 = vld [vmem:[#allocation3 + $0x300] ss:$12 sps:$4 sm:$0xff]   ;;  %v2991_v51 = vld [vmem:[#allocation3 + $0x364] ss:$12 sps:$4 sm:$0xff]  }
  0x47   :  { %v2972_v35 = vld [vmem:[#allocation3 + $0x308] ss:$12 sps:$4 sm:$0xff]   ;;  %vm2359_vm3 = vcmask 7168  }
  0x48   :  { %596 = vmatpush1.bf16.msra.mxu0 %v2890_v37  ;;  %694 = vmatmul.mubr.bf16.vlgmr.msra.gmra.mrb[0].mxu1 %v3236_v38  ;;  %v2973_v37 = vld [vmem:[#allocation3 + $0x248] ss:$12 sps:$4 sm:$0xff]  }
  0x49   :  { %2696 = vmatpush3.bf16.msra.mxu1 %v2891_v39  ;;  %597 = vmatprep.subr.bf16.mxu0 %v2892_v40  ;;  %v2977_v39 = vld [vmem:[#allocation3 + $0x320] ss:$12 sps:$4 sm:$0xff]   ;;  %v2974_v40 = vld [vmem:[#allocation3 + $0x318] ss:$12 sps:$4 sm:$0xff]   ;;  %v2993_v54 = vld [vmem:[#allocation3 + $0x2a8] ss:$12 sps:$4 sm:$0xff]  }
  0x4a   :  { %2697 = vmatprep.subr.bf16.mxu1 %v3168_v41  ;;  %2711 = vmatprep.mubr.msk.bf16.mxu1 %vm3169_vm0, %v3168_v41 }
  0x4c   :  { %598 = vmatpush1.bf16.msra.mxu0 %v2894_v42  ;;  %v2978_v42 = vld [vmem:[#allocation3 + $0x260] ss:$12 sps:$4 sm:$0xff]  }
  0x4d   :  { %2698 = vmatpush3.bf16.msra.mxu1 %v2895_v43  ;;  %599 = vmatprep.subr.bf16.mxu0 %v2896_v44  ;;  %v2981_v43 = vld [vmem:[#allocation3 + $0x334] ss:$12 sps:$4 sm:$0xff]   ;;  %v2982_v44 = vld [vmem:[#allocation3 + $0x338] ss:$12 sps:$4 sm:$0xff]  }
  0x4e   :  { %2699 = vmatprep.subr.bf16.mxu1 %v3168_v41 }
  0x50   :  { %600 = vmatpush1.bf16.msra.mxu0 %v2898_v45  ;;  %v2979_v45 = vld [vmem:[#allocation3 + $0x330] ss:$12 sps:$4 sm:$0xff]  }
  0x51   :  { %2700 = vmatpush3.bf16.msra.mxu1 %v2899_v46  ;;  %601 = vmatprep.subr.bf16.mxu0 %v2900_v47  ;;  %v2983_v46 = vld [vmem:[#allocation3 + $0x278] ss:$12 sps:$4 sm:$0xff]  }
  0x52   :  { %2701 = vmatprep.subr.bf16.mxu1 %v3168_v41  ;;  %v2986_v47 = vld [vmem:[#allocation3 + $0x34c] ss:$12 sps:$4 sm:$0xff]  }
  0x54   :  { %602 = vmatpush1.bf16.msra.mxu0 %v2902_v48  ;;  %v2987_v48 = vld [vmem:[#allocation3 + $0x350] ss:$12 sps:$4 sm:$0xff]  }
  0x55   :  { %2702 = vmatpush3.bf16.msra.mxu1 %v2903_v49  ;;  %603 = vmatprep.subr.bf16.mxu0 %v2904_v50  ;;  %v2984_v49 = vld [vmem:[#allocation3 + $0x348] ss:$12 sps:$4 sm:$0xff]   ;;  %v2988_v50 = vld [vmem:[#allocation3 + $0x290] ss:$12 sps:$4 sm:$0xff]  }
  0x56   :  { %2703 = vmatprep.subr.bf16.mxu1 %v3168_v41 }
  0x58   :  { %604 = vmatpush1.bf16.msra.mxu0 %v2906_v52  ;;  %v2992_v52 = vld [vmem:[#allocation3 + $0x368] ss:$12 sps:$4 sm:$0xff]  }
  0x59   :  { %2704 = vmatpush3.bf16.msra.mxu1 %v2907_v53  ;;  %605 = vmatprep.subr.bf16.mxu0 %v2908_v55  ;;  %v2989_v53 = vld [vmem:[#allocation3 + $0x360] ss:$12 sps:$4 sm:$0xff]   ;;  %v2996_v55 = vld [vmem:[#allocation3 + $0x37c] ss:$12 sps:$4 sm:$0xff]  }
  0x5a   :  { %2705 = vmatprep.subr.bf16.mxu1 %v3168_v41 }
  0x5c   :  { %606 = vmatpush1.bf16.msra.mxu0 %v2910_v56  ;;  %v2997_v56 = vld [vmem:[#allocation3 + $0x380] ss:$12 sps:$4 sm:$0xff]  }
  0x5d   :  { %2706 = vmatpush3.bf16.msra.mxu1 %v2911_v57  ;;  %607 = vmatprep.subr.bf16.mxu0 %v2912_v58  ;;  %v2994_v57 = vld [vmem:[#allocation3 + $0x378] ss:$12 sps:$4 sm:$0xff]   ;;  %v2998_v58 = vld [vmem:[#allocation3 + $0x2c0] ss:$12 sps:$4 sm:$0xff]  }
  0x5e   :  { %2707 = vmatprep.subr.bf16.mxu1 %v3168_v41 }
  0x60   :  { %608 = vmatpush1.bf16.msra.mxu0 %v2914_v59  ;;  %v2999_v59 = vld [vmem:[#allocation3 + $0x390] ss:$12 sps:$4 sm:$0xff]  }
  0x61   :  { %2708 = vmatpush3.bf16.msra.mxu1 %v2915_v60  ;;  %609 = vmatprep.subr.bf16.mxu0 %v2916_v61  ;;  %v3001_v60 = vld [vmem:[#allocation3 + $0x394] ss:$12 sps:$4 sm:$0xff]   ;;  %v3002_v61 = vld [vmem:[#allocation3 + $0x398] ss:$12 sps:$4 sm:$0xff]  }
  0x62   :  { %2709 = vmatprep.subr.bf16.mxu1 %v3168_v41 }
  0x64   :  { %610 = vmatpush1.bf16.msra.mxu0 %v2918_v62  ;;  %v3003_v62 = vld [vmem:[#allocation3 + $0x2d8] ss:$12 sps:$4 sm:$0xff]  }
  0x65   :  { %2710 = vmatpush3.bf16.msra.mxu1 %v2919_v63  ;;  %620 = vmatprep.subr.bf16.mxu0 %v2922_v1  ;;  %v3006_v63 = vld [vmem:[#allocation3 + $0x3ac] ss:$12 sps:$4 sm:$0xff]   ;;  %v3007_v1 = vld [vmem:[#allocation3 + $0x3b0] ss:$12 sps:$4 sm:$0xff]  }
  0x66   :  { %1326 = vmatprep.subr.bf16.mxu1 %v2947_v18 }
  0x67   :  { %612 = vmatmul.mubr.bf16.vlgmr.msra.gmra.mrb[0].mxu0 %v3236_v38  ;;  %v2976_v38 = vld [vmem:[#allocation3 + $0x31c] ss:$12 sps:$4 sm:$0xff]  }
  0x68   :  { %2712 = vmatmul.mubr.bf16.vlgmr.msra.gmra.mrb[4].mxu1 %v2923_v3  ;;  %621 = vmatpush1.bf16.msra.mxu0 %v2920_v2  ;;  %v3004_v2 = vld [vmem:[#allocation3 + $0x3a8] ss:$12 sps:$4 sm:$0xff]  }
  0x69   :  { %622 = vmatprep.subr.bf16.mxu0 %v2926_v4  ;;  %652 = vmatprep.mubr.bf16.mxu0 %v3167_v0  ;;  %v3011_v4 = vld [vmem:[#allocation3 + $0x3c4] ss:$12 sps:$4 sm:$0xff]  }
  0x6a   :  { %1327 = vmatpush1.bf16.msra.mxu1 %v2945_v19 }
  0x6b   :  { %1328 = vmatprep.subr.bf16.mxu1 %v2950_v20 }
  0x6c   :  { %623 = vmatpush1.bf16.msra.mxu0 %v2924_v5 }
  0x6d   :  { %624 = vmatprep.subr.bf16.mxu0 %v2929_v6 }
  0x6e   :  { %1329 = vmatpush1.bf16.msra.mxu1 %v2948_v21 }
  0x6f   :  { %1330 = vmatprep.subr.bf16.mxu1 %v2953_v22  ;;  %v3270_v22 = vld [vmem:[%s3468_s5] sm:$0xff] }
  0x70   :  { %625 = vmatpush1.bf16.msra.mxu0 %v2927_v7 }
  0x71   :  { %626 = vmatprep.subr.bf16.mxu0 %v2932_v8 }
  0x72   :  { %1331 = vmatpush1.bf16.msra.mxu1 %v2951_v23 }
  0x73   :  { %1332 = vmatprep.subr.bf16.mxu1 %v2956_v24  ;;  %v3275_v24 = vld [vmem:[%s3468_s5 + $0x8] sm:$0xff] }
  0x74   :  { %627 = vmatpush1.bf16.msra.mxu0 %v2930_v9 }
  0x75   :  { %628 = vmatprep.subr.bf16.mxu0 %v2935_v10  ;;  %v172_v10 = vlaneseq }
  0x76   :  { %1333 = vmatpush1.bf16.msra.mxu1 %v2954_v25 }
  0x77   :  { %1334 = vmatprep.subr.bf16.mxu1 %v2959_v26 }
  0x78   :  { %629 = vmatpush1.bf16.msra.mxu0 %v2933_v11  ;;  %v3255_v11 = vshrl.u32 %v172_v10, 7 }
  0x79   :  { %630 = vmatprep.subr.bf16.mxu0 %v2938_v12 }
  0x7a   :  { %1335 = vmatpush1.bf16.msra.mxu1 %v2957_v27  ;;  %v3258_v12 = vsub.s32 0, %v3255_v11 }
  0x7b   :  { %1336 = vmatprep.subr.bf16.mxu1 %v2962_v28 }
  0x7c   :  { %631 = vmatpush1.bf16.msra.mxu0 %v2936_v13  ;;  %v3263_v13 = vld [vmem:[%s3468_s5 + $0x10] sm:$0xff]  ;;  %v175_v25 = vrot.slane %v3270_v22, %v3258_v12  ;;  %v179_v26 = vrot.slane %v3275_v24, %v3258_v12 }
  0x7d   :  { %632 = vmatprep.subr.bf16.mxu0 %v2941_v14  ;;  %v183_v14 = vrot.slane %v3263_v13, %v3258_v12 }
  0x7e   :  { %1337 = vmatpush1.bf16.msra.mxu1 %v2960_v29 }
  0x7f   :  { %1338 = vmatprep.subr.bf16.mxu1 %v2965_v30 }
  0x80   :  { %633 = vmatpush1.bf16.msra.mxu0 %v2939_v15 }
  0x81   :  { %634 = vmatprep.subr.bf16.mxu0 %v2944_v16 }
  0x82   :  { %1339 = vmatpush1.bf16.msra.mxu1 %v2963_v31 }
  0x83   :  { %1340 = vmatprep.subr.bf16.mxu1 %v2968_v32 }
  0x84   :  { %635 = vmatpush1.bf16.msra.mxu0 %v2942_v17 }
  0x85   :  { %2601 = vmatprep.subr.bf16.mxu0 %v2972_v35 }
  0x86   :  { %1341 = vmatpush1.bf16.msra.mxu1 %v2966_v33 }
  0x87   :  { %653 = vmatmul.mubr.bf16.vlgmr.msra.gmra.mrb[0].mxu0 %v2923_v3  ;;  %1342 = vmatprep.subr.bf16.mxu1 %v2971_v34  ;;  %v3008_v3 = vld [vmem:[#allocation3 + $0x2f0] ss:$12 sps:$4 sm:$0xff]  }
  0x88   :  { %2602 = vmatpush3.bf16.msra.mxu0 %v2973_v37 }
  0x89   :  { %2603 = vmatprep.subr.bf16.mxu0 %v2977_v39 }
  0x8a   :  { %1343 = vmatpush1.bf16.msra.mxu1 %v2969_v36 }
  0x8b   :  { %1344 = vmatprep.subr.bf16.mxu1 %v2976_v38 }
  0x8c   :  { %2604 = vmatpush3.bf16.msra.mxu0 %v2978_v42 }
  0x8d   :  { %2605 = vmatprep.subr.bf16.mxu0 %v2982_v44 }
  0x8e   :  { %1345 = vmatpush1.bf16.msra.mxu1 %v2974_v40 }
  0x8f   :  { %1346 = vmatprep.subr.bf16.mxu1 %v2981_v43 }
  0x90   :  { %2606 = vmatpush3.bf16.msra.mxu0 %v2983_v46 }
  0x91   :  { %2607 = vmatprep.subr.bf16.mxu0 %v2987_v48 }
  0x92   :  { %1347 = vmatpush1.bf16.msra.mxu1 %v2979_v45 }
  0x93   :  { %1348 = vmatprep.subr.bf16.mxu1 %v2986_v47 }
  0x94   :  { %2608 = vmatpush3.bf16.msra.mxu0 %v2988_v50 }
  0x95   :  { %2609 = vmatprep.subr.bf16.mxu0 %v2992_v52 }
  0x96   :  { %1349 = vmatpush1.bf16.msra.mxu1 %v2984_v49 }
  0x97   :  { %1350 = vmatprep.subr.bf16.mxu1 %v2991_v51 }
  0x98   :  { %2610 = vmatpush3.bf16.msra.mxu0 %v2993_v54 }
  0x99   :  { %2611 = vmatprep.subr.bf16.mxu0 %v2997_v56 }
  0x9a   :  { %1351 = vmatpush1.bf16.msra.mxu1 %v2989_v53 }
  0x9b   :  { %1352 = vmatprep.subr.bf16.mxu1 %v2996_v55 }
  0x9c   :  { %2612 = vmatpush3.bf16.msra.mxu0 %v2998_v58 }
  0x9d   :  { %2613 = vmatprep.subr.bf16.mxu0 %v3002_v61 }
  0x9e   :  { %1353 = vmatpush1.bf16.msra.mxu1 %v2994_v57 }
  0x9f   :  { %1354 = vmatprep.subr.bf16.mxu1 %v3001_v60 }
  0xa0   :  { %2614 = vmatpush3.bf16.msra.mxu0 %v3003_v62 }
  0xa1   :  { %2615 = vmatprep.subr.bf16.mxu0 %v3007_v1 }
  0xa2   :  { %1355 = vmatpush1.bf16.msra.mxu1 %v2999_v59 }
  0xa3   :  { %1356 = vmatprep.subr.bf16.mxu1 %v3006_v63 }
  0xa4   :  { %2616 = vmatpush3.bf16.msra.mxu0 %v3008_v3 }
  0xa5   :  { %2715 = vmatprep.subr.bf16.mxu0 %v3168_v41 }
  0xa6   :  { %1357 = vmatpush1.bf16.msra.mxu1 %v3004_v2 }
  0xa7   :  { %1367 = vmatprep.subr.bf16.mxu1 %v3011_v4 }
 0x11b   :  { %v2586_v5 = vpop.f32.mrb[0].mxu1 }
 0x11c   :  { %v2587_v6 = vpop.f32.mrb[1].mxu1 }
 0x11d   :  { %v2588_v7 = vadd.f32 %v2587_v6, %v2586_v5  ;;  %v2589_v8 = vpop.f32.mrb[2].mxu1 }
 0x11e   :  { %v2590_v9 = vpop.f32.mrb[3].mxu1 }
 0x11f   :  { %v696_v15 = vadd.f32 %v2588_v7, %v183_v14 }
 0x13b   :  { %v735_v16 = vpop.f32.mrb[4].mxu1 }
 0x13c   :  { %v736_v17 = vadd.f32 %v735_v16, %v696_v15  ;;  %v2713_v18 = vpop.f32.mrb[5].mxu1 }
 0x13d   :  { %v738_v19 = vpop.f32.mrb[6].mxu1 }
 0x13e   :  { %v2714_v20 = vpop.f32.mrb[7].mxu1  ;;  %v753_v21 = vrot.slane %v736_v17, 4 }
 0x140   :  { %v754_v23 = vadd.f32 %v753_v21, %v736_v17 }
 0x142   :  { %v755_v27 = vrot.slane %v754_v23, 2 }
 0x144   :  { %v756_v33 = vadd.f32 %v755_v27, %v754_v23  ;;  %v3290_v27 = vsub.s32 2, %v3255_v11 }
 0x146   :  { %v757_v39 = vrot.slane %v756_v33, 1 }
 0x148   :  { %v758_v45 = vadd.f32 %v757_v39, %v756_v33  ;;  %v820_v33 = vrot.slane %v3275_v24, %v3290_v27 }
 0x14a   :  { %v761_v50 = vmul.f32 0.125, %v758_v45 }
 0x14c   :  { %v3281_v55 = vsub.f32 %v736_v17, %v761_v50  ;;  %v3017_v50 = vld [vmem:[#allocation3 + $0x3f0] ss:$12 sps:$4 sm:$0xff]  }
 0x14e   :  { %v767_v60 = vmul.f32 %v3281_v55, %v3281_v55 }
 0x150   :  { %v780_v2 = vrot.slane %v767_v60, 4 }
 0x152   :  { %v781_v7 = vadd.f32 %v780_v2, %v767_v60  ;;  %v3035_v2 = vld [vmem:[#allocation3 + $0x454] ss:$12 sps:$4 sm:$0xff]  }
 0x154   :  { %v782_v15 = vrot.slane %v781_v7, 2 }
 0x156   :  { %v783_v18 = vadd.f32 %v782_v15, %v781_v7  ;;  %v3042_v15 = vld [vmem:[#allocation5 + $0x40] sm:$0xff]  }
 0x158   :  { %v784_v19 = vrot.slane %v783_v18, 1 }
 0x15a   :  { %v654_v28 = vpop.f32.mrb[0].mxu0  ;;  %v785_v21 = vadd.f32 %v784_v19, %v783_v18  ;;  %v3045_v18 = vld [vmem:[#allocation5 + $0x48] sm:$0xff]  }
 0x15b   :  { %v2827_v29 = vadd.f32 %v654_v28, %v175_v25  ;;  %v656_v30 = vpop.f32.mrb[1].mxu0  ;;  %v3286_v25 = vsub.s32 1, %v3255_v11  ;;  %v3046_v19 = vld [vmem:[#allocation5 + $0x8] sm:$0xff]  }
 0x15c   :  { %v2828_v31 = vadd.f32 %v656_v30, %v179_v26  ;;  %v658_v32 = vpop.f32.mrb[2].mxu0  ;;  %v816_v30 = vrot.slane %v3270_v22, %v3290_v27 }
 0x15d   :  { %v741_v34 = vrot.slane %v2827_v29, 4  ;;  %v659_v35 = vpop.f32.mrb[3].mxu0 }
 0x15e   :  { %v747_v36 = vrot.slane %v2828_v31, 4 }
 0x15f   :  { %v742_v37 = vadd.f32 %v2827_v29, %v741_v34 }
 0x160   :  { %v748_v38 = vadd.f32 %v2828_v31, %v747_v36 }
 0x161   :  { %v743_v40 = vrot.slane %v742_v37, 2 }
 0x162   :  { %v749_v42 = vrot.slane %v748_v38, 2 }
 0x163   :  { %v744_v43 = vadd.f32 %v743_v40, %v742_v37 }
 0x164   :  { %v750_v44 = vadd.f32 %v749_v42, %v748_v38 }
 0x165   :  { %v745_v46 = vrot.slane %v744_v43, 1 }
 0x166   :  { %v751_v47 = vrot.slane %v750_v44, 1 }
 0x167   :  { %v746_v48 = vadd.f32 %v745_v46, %v744_v43  ;;  %v3009_v43 = vld [vmem:[#allocation3 + $0x3c0] ss:$12 sps:$4 sm:$0xff]   ;;  %v3015_v46 = vld [vmem:[#allocation3 + $0x3dc] ss:$12 sps:$4 sm:$0xff]  }
 0x168   :  { %v752_v49 = vadd.f32 %v751_v47, %v750_v44  ;;  %v3012_v44 = vld [vmem:[#allocation3 + $0x3c8] ss:$12 sps:$4 sm:$0xff]   ;;  %v3013_v47 = vld [vmem:[#allocation3 + $0x3d8] ss:$12 sps:$4 sm:$0xff]  }
 0x169   :  { %v759_v51 = vmul.f32 0.125, %v746_v48  ;;  %v3016_v48 = vld [vmem:[#allocation3 + $0x3e0] ss:$12 sps:$4 sm:$0xff]  }
 0x16a   :  { %v760_v52 = vmul.f32 0.125, %v752_v49  ;;  %v3019_v49 = vld [vmem:[#allocation3 + $0x3f4] ss:$12 sps:$4 sm:$0xff]  }
 0x16b   :  { %v762_v53 = vsub.f32 %v2827_v29, %v759_v51  ;;  %v3020_v51 = vld [vmem:[#allocation3 + $0x3f8] ss:$12 sps:$4 sm:$0xff]  }
 0x16c   :  { %v763_v54 = vsub.f32 %v2828_v31, %v760_v52  ;;  %v788_v31 = vmul.f32 0.125, %v785_v21  ;;  %v3023_v52 = vld [vmem:[#allocation3 + $0x40c] ss:$12 sps:$4 sm:$0xff]   ;;  %v3048_v21 = vld [vmem:[#allocation5 + $0x50] sm:$0xff]  }
 0x16d   :  { %v765_v56 = vmul.f32 %v762_v53, %v762_v53 }
 0x16e   :  { %v766_v57 = vmul.f32 %v763_v54, %v763_v54  ;;  %v791_v37 = vadd.f32 1e-05, %v788_v31  ;;  %v3054_v31 = vld [vmem:[#allocation5 + $0x60] sm:$0xff]  }
 0x16f   :  { %v768_v58 = vrot.slane %v765_v56, 4 }
 0x170   :  { %v774_v59 = vrot.slane %v766_v57, 4 }
 0x171   :  { %v769_v61 = vadd.f32 %v768_v58, %v765_v56  ;;  %v3024_v56 = vld [vmem:[#allocation3 + $0x410] ss:$12 sps:$4 sm:$0xff]   ;;  %v3025_v58 = vld [vmem:[#allocation3 + $0x420] ss:$12 sps:$4 sm:$0xff]  }
 0x172   :  { %v775_v62 = vadd.f32 %v774_v59, %v766_v57  ;;  %v3028_v59 = vld [vmem:[#allocation3 + $0x428] ss:$12 sps:$4 sm:$0xff]  }
 0x173   :  { %v770_v63 = vrot.slane %v769_v61, 2 }
 0x174   :  { %v776_v1 = vrot.slane %v775_v62, 2 }
 0x175   :  { %v771_v3 = vadd.f32 %v770_v63, %v769_v61  ;;  %v3031_v61 = vld [vmem:[#allocation3 + $0x43c] ss:$12 sps:$4 sm:$0xff]   ;;  %v3032_v63 = vld [vmem:[#allocation3 + $0x440] ss:$12 sps:$4 sm:$0xff]  }
 0x176   :  { %v777_v4 = vadd.f32 %v776_v1, %v775_v62  ;;  %v3029_v62 = vld [vmem:[#allocation3 + $0x438] ss:$12 sps:$4 sm:$0xff]  }
 0x177   :  { %v772_v5 = vrot.slane %v771_v3, 1 }
 0x178   :  { %v778_v6 = vrot.slane %v777_v4, 1 }
 0x179   :  { %v773_v8 = vadd.f32 %v772_v5, %v771_v3  ;;  %v824_v3 = vrot.slane %v3263_v13, %v3290_v27  ;;  %v3036_v5 = vld [vmem:[#allocation3 + $0x458] ss:$12 sps:$4 sm:$0xff]  }
 0x17a   :  { %v779_v9 = vadd.f32 %v778_v6, %v777_v4  ;;  %v3033_v4 = vld [vmem:[#allocation3 + $0x450] ss:$12 sps:$4 sm:$0xff]   ;;  %v3039_v6 = vld [vmem:[#allocation3 + $0x46c] ss:$12 sps:$4 sm:$0xff]  }
 0x17b   :  { %v786_v10 = vmul.f32 0.125, %v773_v8  ;;  %v3037_v8 = vld [vmem:[#allocation3 + $0x468] ss:$12 sps:$4 sm:$0xff]  }
 0x17c   :  { %v787_v14 = vmul.f32 0.125, %v779_v9 }
 0x17d   :  { %v789_v16 = vadd.f32 1e-05, %v786_v10 }
 0x17e   :  { %v790_v17 = vadd.f32 1e-05, %v787_v14  ;;  %v3041_v14 = vld [vmem:[#allocation5 + $0x80] sm:$0xff]  }
 0x17f   :  { %3093 = vrsqrt.f32 %v789_v16  ;;  %v3043_v16 = vld [vmem:[#allocation5] sm:$0xff]  }
 0x180   :  { %3095 = vrsqrt.f32 %v790_v17  ;;  %v3044_v17 = vld [vmem:[#allocation5 + $0x88] sm:$0xff]  }
 0x181   :  { %3097 = vrsqrt.f32 %v791_v37  ;;  %v3060_v37 = vld [vmem:[#allocation5 + $0x70] sm:$0xff]  }
 0x189   :  { %v3094_v20 = vpop.eup %3093 }
 0x18a   :  { %v3096_v23 = vpop.eup %3095  ;;  %v795_v26 = vmul.f32 %v3094_v20, %v3270_v22  ;;  %v3047_v20 = vld [vmem:[#allocation5 + $0x90] sm:$0xff]  }
 0x18b   :  { %v796_v28 = vmul.f32 %v3096_v23, %v3275_v24  ;;  %v3049_v23 = vld [vmem:[#allocation5 + $0x10] sm:$0xff]  }
 0x18c   :  { %v801_v29 = vrot.slane %v795_v26, %v3286_v25  ;;  %v3050_v26 = vld [vmem:[#allocation5 + $0x98] sm:$0xff]  }
 0x18d   :  { %v805_v32 = vrot.slane %v796_v28, %v3286_v25  ;;  %v3051_v28 = vld [vmem:[#allocation5 + $0x58] sm:$0xff]  }
 0x18e   :  { %v810_v34 = vmul.f32 %v801_v29, %v762_v53  ;;  %v3098_v53 = vpop.eup %3097  ;;  %v3052_v29 = vld [vmem:[#allocation5 + $0x18] sm:$0xff]  }
 0x18f   :  { %v811_v35 = vmul.f32 %v805_v32, %v763_v54  ;;  %v3021_v54 = vld [vmem:[#allocation3 + $0x408] ss:$12 sps:$4 sm:$0xff]   ;;  %v797_v57 = vmul.f32 %v3098_v53, %v3263_v13  ;;  %v3055_v32 = vld [vmem:[#allocation5 + $0x20] sm:$0xff]  }
 0x190   :  { %v825_v36 = vadd.f32 %v816_v30, %v810_v34  ;;  %v3053_v30 = vld [vmem:[#allocation5 + $0xa0] sm:$0xff]   ;;  %v3057_v34 = vld [vmem:[#allocation5 + $0x68] sm:$0xff]  }
 0x191   :  { %v826_v38 = vadd.f32 %v820_v33, %v811_v35  ;;  %v809_v60 = vrot.slane %v797_v57, %v3286_v25  ;;  %v3056_v33 = vld [vmem:[#allocation5 + $0xa8] sm:$0xff]  }
 0x192   :  { %v828_v39 = vmax.f32 %v825_v36, 0.0  ;;  %v3058_v35 = vld [vmem:[#allocation5 + $0x28] sm:$0xff]   ;;  %v3059_v36 = vld [vmem:[#allocation5 + $0xb0] sm:$0xff]  }
 0x193   :  { %v829_v40 = vmax.f32 %v826_v38, 0.0  ;;  %v812_v1 = vmul.f32 %v809_v60, %v3281_v55  ;;  %v3040_v55 = vld [vmem:[#allocation3 + $0x470] ss:$12 sps:$4 sm:$0xff]  }
 0x194   :  { %v927_v45 = vpack.c.bf16 %v828_v39, %v828_v39  ;;  %v3061_v38 = vld [vmem:[#allocation5 + $0x30] sm:$0xff]   ;;  %v3062_v39 = vld [vmem:[#allocation5 + $0xb8] sm:$0xff]  }
 0x195   :  { %v928_v42 = vpack.c.bf16 %v829_v40, %v829_v40  ;;  %v827_v7 = vadd.f32 %v824_v3, %v812_v1  ;;  %v3063_v40 = vld [vmem:[#allocation5 + $0x78] sm:$0xff]  }
 0x197   :  { %1358 = vmatprep.mubr.bf16.mxu1 %v928_v42  ;;  %1440 = vmatprep.mubr.bf16.mxu0 %v928_v42  ;;  %v830_v9 = vmax.f32 %v827_v7, 0.0  ;;  %v3064_v42 = vld [vmem:[#allocation5 + $0x38] sm:$0xff]  }
 0x198   :  { %1359 = vmatmul.mubr.bf16.vlgmr.msra.gmra.mrb[8].mxu1 %v927_v45  ;;  %1441 = vmatmul.mubr.bf16.vlgmr.msra.gmra.mrb[4].mxu0 %v927_v45 }
 0x199   :  { %1368 = vmatpush1.bf16.msra.mxu1 %v3009_v43  ;;  %2716 = vmatpush3.bf16.msra.mxu0 %v3012_v44  ;;  %v929_v10 = vpack.c.bf16 %v830_v9, %v830_v9 }
 0x19a   :  { %1369 = vmatprep.subr.bf16.mxu1 %v3015_v46  ;;  %2717 = vmatprep.subr.bf16.mxu0 %v3168_v41 }
 0x19b   :  { %1399 = vmatprep.mubr.bf16.mxu1 %v3167_v0  ;;  %2731 = vmatprep.mubr.msk.bf16.mxu0 %vm3169_vm0, %v3168_v41  ;;  %v3027_v0 = vld [vmem:[#allocation3 + $0x424] ss:$12 sps:$4 sm:$0xff]  }
 0x19d   :  { %1370 = vmatpush1.bf16.msra.mxu1 %v3013_v47  ;;  %2718 = vmatpush3.bf16.msra.mxu0 %v3016_v48  ;;  %v3327_v48 = vsub.s32 3, %v3255_v11 }
 0x19e   :  { %1371 = vmatprep.subr.bf16.mxu1 %v3019_v49  ;;  %2719 = vmatprep.subr.bf16.mxu0 %v3168_v41 }
 0x19f   :  { %v941_v49 = vrot.slane %v3263_v13, %v3327_v48 }
 0x1a1   :  { %1372 = vmatpush1.bf16.msra.mxu1 %v3017_v50  ;;  %2720 = vmatpush3.bf16.msra.mxu0 %v3020_v51  ;;  %v933_v50 = vrot.slane %v3270_v22, %v3327_v48  ;;  %v937_v51 = vrot.slane %v3275_v24, %v3327_v48 }
 0x1a2   :  { %1373 = vmatprep.subr.bf16.mxu1 %v3023_v52  ;;  %2721 = vmatprep.subr.bf16.mxu0 %v3168_v41 }
 0x1a5   :  { %1374 = vmatpush1.bf16.msra.mxu1 %v3021_v54  ;;  %2722 = vmatpush3.bf16.msra.mxu0 %v3024_v56 }
 0x1a6   :  { %1375 = vmatprep.subr.bf16.mxu1 %v3027_v0  ;;  %2723 = vmatprep.subr.bf16.mxu0 %v3168_v41 }
 0x1a9   :  { %1376 = vmatpush1.bf16.msra.mxu1 %v3025_v58  ;;  %2724 = vmatpush3.bf16.msra.mxu0 %v3028_v59 }
 0x1aa   :  { %1377 = vmatprep.subr.bf16.mxu1 %v3031_v61  ;;  %2725 = vmatprep.subr.bf16.mxu0 %v3168_v41 }
 0x1ad   :  { %1378 = vmatpush1.bf16.msra.mxu1 %v3029_v62  ;;  %2726 = vmatpush3.bf16.msra.mxu0 %v3032_v63 }
 0x1ae   :  { %1379 = vmatprep.subr.bf16.mxu1 %v3035_v2  ;;  %2727 = vmatprep.subr.bf16.mxu0 %v3168_v41 }
 0x1b1   :  { %1380 = vmatpush1.bf16.msra.mxu1 %v3033_v4  ;;  %2728 = vmatpush3.bf16.msra.mxu0 %v3036_v5 }
 0x1b2   :  { %1381 = vmatprep.subr.bf16.mxu1 %v3039_v6  ;;  %2729 = vmatprep.subr.bf16.mxu0 %v3168_v41 }
 0x1b5   :  { %1382 = vmatpush1.bf16.msra.mxu1 %v3037_v8  ;;  %2730 = vmatpush3.bf16.msra.mxu0 %v3040_v55 }
 0x1b6   :  { %2735 = vmatprep.subr.bf16.mxu1 %v3168_v41  ;;  %2632 = vmatprep.subr.bf16.mxu0 %v3042_v15 }
 0x1b8   :  { %1400 = vmatmul.mubr.bf16.vlgmr.msra.gmra.mrb[8].mxu1 %v929_v10  ;;  %2732 = vmatmul.mubr.bf16.vlgmr.msra.gmra.mrb[8].mxu0 %v929_v10 }
 0x1b9   :  { %2751 = vmatprep.mubr.msk.bf16.mxu1 %vm3169_vm0, %v3168_v41  ;;  %2736 = vmatpush3.bf16.msra.mxu1 %v3041_v14 }
 0x1ba   :  { %2737 = vmatprep.subr.bf16.mxu1 %v3168_v41  ;;  %2633 = vmatpush3.bf16.msra.mxu0 %v3043_v16 }
 0x1bb   :  { %2634 = vmatprep.subr.bf16.mxu0 %v3045_v18 }
 0x1bd   :  { %2738 = vmatpush3.bf16.msra.mxu1 %v3044_v17 }
 0x1be   :  { %2739 = vmatprep.subr.bf16.mxu1 %v3168_v41  ;;  %2635 = vmatpush3.bf16.msra.mxu0 %v3046_v19 }
 0x1bf   :  { %2636 = vmatprep.subr.bf16.mxu0 %v3048_v21 }
 0x1c1   :  { %2740 = vmatpush3.bf16.msra.mxu1 %v3047_v20 }
 0x1c2   :  { %2741 = vmatprep.subr.bf16.mxu1 %v3168_v41  ;;  %2637 = vmatpush3.bf16.msra.mxu0 %v3049_v23 }
 0x1c3   :  { %2638 = vmatprep.subr.bf16.mxu0 %v3051_v28 }
 0x1c5   :  { %2742 = vmatpush3.bf16.msra.mxu1 %v3050_v26 }
 0x1c6   :  { %2743 = vmatprep.subr.bf16.mxu1 %v3168_v41  ;;  %2639 = vmatpush3.bf16.msra.mxu0 %v3052_v29 }
 0x1c7   :  { %2640 = vmatprep.subr.bf16.mxu0 %v3054_v31 }
 0x1c9   :  { %2744 = vmatpush3.bf16.msra.mxu1 %v3053_v30 }
 0x1ca   :  { %2745 = vmatprep.subr.bf16.mxu1 %v3168_v41  ;;  %2641 = vmatpush3.bf16.msra.mxu0 %v3055_v32 }
 0x1cb   :  { %2642 = vmatprep.subr.bf16.mxu0 %v3057_v34 }
 0x1cd   :  { %2746 = vmatpush3.bf16.msra.mxu1 %v3056_v33 }
 0x1ce   :  { %2747 = vmatprep.subr.bf16.mxu1 %v3168_v41  ;;  %2643 = vmatpush3.bf16.msra.mxu0 %v3058_v35 }
 0x1cf   :  { %2644 = vmatprep.subr.bf16.mxu0 %v3060_v37 }
 0x1d1   :  { %2748 = vmatpush3.bf16.msra.mxu1 %v3059_v36 }
 0x1d2   :  { %2749 = vmatprep.subr.bf16.mxu1 %v3168_v41  ;;  %2645 = vmatpush3.bf16.msra.mxu0 %v3061_v38 }
 0x1d3   :  { %2646 = vmatprep.subr.bf16.mxu0 %v3063_v40 }
 0x1d5   :  { %2750 = vmatpush3.bf16.msra.mxu1 %v3062_v39 }
 0x1d6   :  { %2775 = vmatprep.subr.bf16.mxu1 %v3168_v41  ;;  %2647 = vmatpush3.bf16.msra.mxu0 %v3064_v42 }
 0x1d7   :  { %2755 = vmatprep.subr.bf16.mxu0 %v3168_v41 }
 0x26b   :  { %v2617_v43 = vpop.f32.mrb[4].mxu0 }
 0x26c   :  { %v2618_v44 = vpop.f32.mrb[5].mxu0 }
 0x26d   :  { %v2619_v45 = vadd.f32 %v2618_v44, %v2617_v43  ;;  %v2620_v46 = vpop.f32.mrb[6].mxu0 }
 0x26e   :  { %v2621_v47 = vpop.f32.mrb[7].mxu0 }
 0x26f   :  { %v1443_v52 = vadd.f32 %v2619_v45, %v941_v49 }
 0x28b   :  { %v1401_v53 = vpop.f32.mrb[8].mxu1  ;;  %v1482_v54 = vpop.f32.mrb[8].mxu0 }
 0x28c   :  { %v2829_v56 = vadd.f32 %v1401_v53, %v933_v50  ;;  %v1483_v57 = vadd.f32 %v1482_v54, %v1443_v52  ;;  %v1403_v0 = vpop.f32.mrb[9].mxu1  ;;  %v2733_v58 = vpop.f32.mrb[9].mxu0 }
 0x28d   :  { %v2830_v59 = vadd.f32 %v1403_v0, %v937_v51  ;;  %v1405_v60 = vpop.f32.mrb[10].mxu1  ;;  %v1485_v61 = vpop.f32.mrb[10].mxu0 }
 0x28e   :  { %v1488_v62 = vrot.slane %v2829_v56, 4  ;;  %v1500_v63 = vrot.slane %v1483_v57, 4  ;;  %v1406_v1 = vpop.f32.mrb[11].mxu1  ;;  %v2734_v2 = vpop.f32.mrb[11].mxu0  ;;  %v3336_v60 = vsub.s32 4, %v3255_v11  ;;  %v3339_v61 = vsub.s32 5, %v3255_v11 }
 0x28f   :  { %v1494_v3 = vrot.slane %v2830_v59, 4 }
 0x290   :  { %v1489_v4 = vadd.f32 %v2829_v56, %v1488_v62  ;;  %v1501_v5 = vadd.f32 %v1500_v63, %v1483_v57 }
 0x291   :  { %v1495_v6 = vadd.f32 %v2830_v59, %v1494_v3 }
 0x292   :  { %v1490_v7 = vrot.slane %v1489_v4, 2  ;;  %v1502_v8 = vrot.slane %v1501_v5, 2 }
 0x293   :  { %v1496_v55 = vrot.slane %v1495_v6, 2 }
 0x294   :  { %v1491_v9 = vadd.f32 %v1490_v7, %v1489_v4  ;;  %v1503_v10 = vadd.f32 %v1502_v8, %v1501_v5  ;;  %v1571_v8 = vrot.slane %v3263_v13, %v3339_v61 }
 0x295   :  { %v1497_v14 = vadd.f32 %v1496_v55, %v1495_v6  ;;  %v1563_v6 = vrot.slane %v3270_v22, %v3339_v61 }
 0x296   :  { %v1492_v15 = vrot.slane %v1491_v9, 1  ;;  %v1504_v16 = vrot.slane %v1503_v10, 1 }
 0x297   :  { %v1498_v17 = vrot.slane %v1497_v14, 1 }
 0x298   :  { %v1493_v18 = vadd.f32 %v1492_v15, %v1491_v9  ;;  %v1505_v19 = vadd.f32 %v1504_v16, %v1503_v10  ;;  %v1567_v10 = vrot.slane %v3275_v24, %v3339_v61 }
 0x299   :  { %v1499_v20 = vadd.f32 %v1498_v17, %v1497_v14 }
 0x29a   :  { %v1506_v21 = vmul.f32 0.125, %v1493_v18  ;;  %v1508_v23 = vmul.f32 0.125, %v1505_v19 }
 0x29b   :  { %v1507_v26 = vmul.f32 0.125, %v1499_v20 }
 0x29c   :  { %v1509_v28 = vsub.f32 %v2829_v56, %v1506_v21  ;;  %v1511_v29 = vsub.f32 %v1483_v57, %v1508_v23 }
 0x29d   :  { %v1510_v30 = vsub.f32 %v2830_v59, %v1507_v26 }
 0x29e   :  { %v1512_v31 = vmul.f32 %v1509_v28, %v1509_v28  ;;  %v1514_v32 = vmul.f32 %v1511_v29, %v1511_v29 }
 0x29f   :  { %v1513_v33 = vmul.f32 %v1510_v30, %v1510_v30 }
 0x2a0   :  { %v1515_v34 = vrot.slane %v1512_v31, 4  ;;  %v1527_v35 = vrot.slane %v1514_v32, 4 }
 0x2a1   :  { %v1521_v36 = vrot.slane %v1513_v33, 4 }
 0x2a2   :  { %v1516_v37 = vadd.f32 %v1515_v34, %v1512_v31  ;;  %v1528_v38 = vadd.f32 %v1527_v35, %v1514_v32  ;;  %v3065_v31 = vld [vmem:[#allocation5 + $0xc0] sm:$0xff]   ;;  %v3072_v34 = vld [vmem:[#allocation5 + $0xf8] sm:$0xff]   ;;  %v1631_v35 = vsub.s32 6, %v3255_v11 }
 0x2a3   :  { %v1522_v39 = vadd.f32 %v1521_v36, %v1513_v33  ;;  %v3071_v33 = vld [vmem:[#allocation5 + $0xf0] sm:$0xff]  }
 0x2a4   :  { %v1517_v40 = vrot.slane %v1516_v37, 2  ;;  %v1529_v42 = vrot.slane %v1528_v38, 2 }
 0x2a5   :  { %v1523_v43 = vrot.slane %v1522_v39, 2 }
 0x2a6   :  { %v1518_v44 = vadd.f32 %v1517_v40, %v1516_v37  ;;  %v1530_v45 = vadd.f32 %v1529_v42, %v1528_v38  ;;  %v1632_v40 = vrot.slane %v3270_v22, %v1631_v35 }
 0x2a7   :  { %v1524_v46 = vadd.f32 %v1523_v43, %v1522_v39 }
 0x2a8   :  { %v1519_v47 = vrot.slane %v1518_v44, 1  ;;  %v1531_v49 = vrot.slane %v1530_v45, 1 }
 0x2a9   :  { %v1525_v50 = vrot.slane %v1524_v46, 1 }
 0x2aa   :  { %v1520_v51 = vadd.f32 %v1519_v47, %v1518_v44  ;;  %v1532_v52 = vadd.f32 %v1531_v49, %v1530_v45 }
 0x2ab   :  { %v1526_v53 = vadd.f32 %v1525_v50, %v1524_v46 }
 0x2ac   :  { %v1533_v54 = vmul.f32 0.125, %v1520_v51  ;;  %v1535_v56 = vmul.f32 0.125, %v1532_v52  ;;  %v3073_v52 = vld [vmem:[#allocation5 + $0x100] sm:$0xff]  }
 0x2ad   :  { %v1534_v57 = vmul.f32 0.125, %v1526_v53  ;;  %v3074_v53 = vld [vmem:[#allocation5 + $0x108] sm:$0xff]  }
 0x2ae   :  { %v1536_v0 = vadd.f32 1e-05, %v1533_v54  ;;  %v1538_v58 = vadd.f32 1e-05, %v1535_v56  ;;  %v3075_v54 = vld [vmem:[#allocation5 + $0x110] sm:$0xff]   ;;  %v3076_v56 = vld [vmem:[#allocation5 + $0x118] sm:$0xff]  }
 0x2af   :  { %v1537_v59 = vadd.f32 1e-05, %v1534_v57  ;;  %v3077_v57 = vld [vmem:[#allocation5 + $0x120] sm:$0xff]  }
 0x2b0   :  { %3099 = vrsqrt.f32 %v1536_v0  ;;  %v3078_v0 = vld [vmem:[#allocation5 + $0x128] sm:$0xff]  }
 0x2b1   :  { %3101 = vrsqrt.f32 %v1538_v58  ;;  %v3079_v58 = vld [vmem:[#allocation5 + $0x130] sm:$0xff]  }
 0x2b2   :  { %3103 = vrsqrt.f32 %v1537_v59  ;;  %v3080_v59 = vld [vmem:[#allocation5 + $0x138] sm:$0xff]  }
 0x2ba   :  { %v3100_v62 = vpop.eup %3099 }
 0x2bb   :  { %v3102_v63 = vpop.eup %3101  ;;  %v1542_v1 = vmul.f32 %v3100_v62, %v3270_v22  ;;  %v1877_v62 = vsub.s32 7, %v3255_v11 }
 0x2bc   :  { %v3104_v2 = vpop.eup %3103  ;;  %v1544_v3 = vmul.f32 %v3102_v63, %v3263_v13  ;;  %v3066_v13 = vld [vmem:[#allocation5 + $0xc8] sm:$0xff]  }
 0x2bd   :  { %v1548_v4 = vrot.slane %v1542_v1, %v3336_v60  ;;  %v1543_v5 = vmul.f32 %v3104_v2, %v3275_v24  ;;  %v3067_v24 = vld [vmem:[#allocation5 + $0xd0] sm:$0xff]   ;;  %v1878_v63 = vrot.slane %v3270_v22, %v1877_v62 }
 0x2be   :  { %v1556_v7 = vrot.slane %v1544_v3, %v3336_v60 }
 0x2bf   :  { %v1557_v55 = vmul.f32 %v1548_v4, %v1509_v28  ;;  %v1552_v9 = vrot.slane %v1543_v5, %v3336_v60  ;;  %v3068_v28 = vld [vmem:[#allocation5 + $0xd8] sm:$0xff]  }
 0x2c0   :  { %v1559_v14 = vmul.f32 %v1556_v7, %v1511_v29  ;;  %v3069_v29 = vld [vmem:[#allocation5 + $0xe0] sm:$0xff]  }
 0x2c1   :  { %v1558_v15 = vmul.f32 %v1552_v9, %v1510_v30  ;;  %v1572_v16 = vadd.f32 %v1563_v6, %v1557_v55  ;;  %v3070_v30 = vld [vmem:[#allocation5 + $0xe8] sm:$0xff]  }
 0x2c2   :  { %v1574_v17 = vadd.f32 %v1571_v8, %v1559_v14 }
 0x2c3   :  { %v1573_v18 = vadd.f32 %v1567_v10, %v1558_v15  ;;  %v1575_v20 = vmax.f32 %v1572_v16, 0.0 }
 0x2c4   :  { %v1577_v19 = vmax.f32 %v1574_v17, 0.0 }
 0x2c5   :  { %v1576_v21 = vmax.f32 %v1573_v18, 0.0  ;;  %v1626_v32 = vpack.c.bf16 %v1575_v20, %v1575_v20 }
 0x2c6   :  { %v1628_v23 = vpack.c.bf16 %v1577_v19, %v1577_v19 }
 0x2c7   :  { %v1627_v26 = vpack.c.bf16 %v1576_v21, %v1576_v21 }
 0x2c8   :  { %2752 = vmatmul.mubr.bf16.vlgmr.msra.gmra.mrb[12].mxu1 %v1628_v23 }
 0x2c9   :  { %1809 = vmatprep.mubr.bf16.mxu0 %v1627_v26  ;;  %2791 = vmatprep.mubr.msk.bf16.mxu1 %vm3169_vm0, %v3168_v41 }
 0x2ca   :  { %1810 = vmatmul.mubr.bf16.vlgmr.msra.gmra.mrb[12].mxu0 %v1626_v32  ;;  %2776 = vmatpush3.bf16.msra.mxu1 %v3073_v52 }
 0x2cb   :  { %2756 = vmatpush3.bf16.msra.mxu0 %v3065_v31  ;;  %2771 = vmatprep.mubr.msk.bf16.mxu0 %vm3169_vm0, %v3168_v41  ;;  %v3386_v31 = vld [vmem:[%s3468_s5 + $0x18] sm:$0xff] }
 0x2cc   :  { %2757 = vmatprep.subr.bf16.mxu0 %v3168_v41  ;;  %2777 = vmatprep.subr.bf16.mxu1 %v3168_v41 }
 0x2ce   :  { %2778 = vmatpush3.bf16.msra.mxu1 %v3074_v53 }
 0x2cf   :  { %2758 = vmatpush3.bf16.msra.mxu0 %v3066_v13  ;;  %2779 = vmatprep.subr.bf16.mxu1 %v3168_v41 }
 0x2d0   :  { %2759 = vmatprep.subr.bf16.mxu0 %v3168_v41 }
 0x2d2   :  { %2780 = vmatpush3.bf16.msra.mxu1 %v3075_v54 }
 0x2d3   :  { %2760 = vmatpush3.bf16.msra.mxu0 %v3067_v24  ;;  %2781 = vmatprep.subr.bf16.mxu1 %v3168_v41 }
 0x2d4   :  { %2761 = vmatprep.subr.bf16.mxu0 %v3168_v41 }
 0x2d6   :  { %2782 = vmatpush3.bf16.msra.mxu1 %v3076_v56 }
 0x2d7   :  { %2762 = vmatpush3.bf16.msra.mxu0 %v3068_v28  ;;  %2783 = vmatprep.subr.bf16.mxu1 %v3168_v41  ;;  %v1994_v28 = vrot.slane %v3386_v31, %v3286_v25  ;;  %v3083_v25 = vld [vmem:[%s3467_s4 + $0x10] sm:$0xff]  }
 0x2d8   :  { %2763 = vmatprep.subr.bf16.mxu0 %v3168_v41 }
 0x2da   :  { %2784 = vmatpush3.bf16.msra.mxu1 %v3077_v57 }
 0x2db   :  { %2764 = vmatpush3.bf16.msra.mxu0 %v3069_v29  ;;  %2785 = vmatprep.subr.bf16.mxu1 %v3168_v41 }
 0x2dc   :  { %2765 = vmatprep.subr.bf16.mxu0 %v3168_v41 }
 0x2de   :  { %2786 = vmatpush3.bf16.msra.mxu1 %v3078_v0 }
 0x2df   :  { %2766 = vmatpush3.bf16.msra.mxu0 %v3070_v30  ;;  %2787 = vmatprep.subr.bf16.mxu1 %v3168_v41 }
 0x2e0   :  { %2767 = vmatprep.subr.bf16.mxu0 %v3168_v41 }
 0x2e2   :  { %2788 = vmatpush3.bf16.msra.mxu1 %v3079_v58 }
 0x2e3   :  { %2768 = vmatpush3.bf16.msra.mxu0 %v3071_v33  ;;  %2789 = vmatprep.subr.bf16.mxu1 %v3168_v41 }
 0x2e4   :  { %2769 = vmatprep.subr.bf16.mxu0 %v3168_v41 }
 0x2e6   :  { %2790 = vmatpush3.bf16.msra.mxu1 %v3080_v59 }
 0x2e7   :  { %2770 = vmatpush3.bf16.msra.mxu0 %v3072_v34  ;;  %2815 = vmatprep.subr.bf16.mxu1 %v3168_v41 }
 0x2e8   :  { %2795 = vmatprep.subr.bf16.mxu0 %v3168_v41 }
 0x39b   :  { %v1851_v36 = vpop.f32.mrb[12].mxu1 }
 0x39c   :  { %v2753_v37 = vpop.f32.mrb[13].mxu1 }
 0x39d   :  { %v2648_v38 = vpop.f32.mrb[12].mxu0  ;;  %v1854_v39 = vpop.f32.mrb[14].mxu1  ;;  %v3084_v37 = vld [vmem:[%s3467_s4 + $0x18] sm:$0xff]  }
 0x39e   :  { %v2649_v42 = vpop.f32.mrb[13].mxu0  ;;  %v2754_v43 = vpop.f32.mrb[15].mxu1  ;;  %v3086_v39 = vld [vmem:[%s3467_s4 + $0x28] sm:$0xff]  }
 0x39f   :  { %v2650_v44 = vadd.f32 %v2649_v42, %v2648_v38  ;;  %v2651_v45 = vpop.f32.mrb[14].mxu0  ;;  %v3085_v38 = vld [vmem:[%s3467_s4 + $0x20] sm:$0xff]   ;;  %v3088_v42 = vld [vmem:[%s3467_s4 + $0x38] sm:$0xff]   ;;  %v2017_v43 = vrot.slane %v3386_v31, %v3290_v27 }
 0x3a0   :  { %v2652_v46 = vpop.f32.mrb[15].mxu0 }
 0x3a1   :  { %v1812_v47 = vadd.f32 %v2650_v44, %v1632_v40  ;;  %v3087_v40 = vld [vmem:[%s3467_s4 + $0x30] sm:$0xff]  }
 0x3a3   :  { %v1852_v49 = vadd.f32 %v1851_v36, %v1812_v47  ;;  %v3081_v36 = vld [vmem:[%s3467_s4] sm:$0xff]  }
 0x3a5   :  { %v1857_v50 = vmax.f32 %v1852_v49, 0.0 }
 0x3a7   :  { %v1874_v51 = vpack.c.bf16 %v1857_v50, %v1857_v50 }
 0x3a9   :  { %2772 = vmatmul.mubr.bf16.vlgmr.msra.gmra.mrb[16].mxu0 %v1874_v51 }
 0x3aa   :  { %2811 = vmatprep.mubr.msk.bf16.mxu0 %vm3169_vm0, %v3168_v41  ;;  %2796 = vmatpush3.bf16.msra.mxu0 %v3081_v36 }
 0x3ab   :  { %2797 = vmatprep.subr.bf16.mxu0 %v3168_v41 }
 0x47c   :  { %v1961_v1 = vpop.f32.mrb[16].mxu0 }
 0x47d   :  { %v1962_v2 = vadd.f32 %v1961_v1, %v1878_v63  ;;  %v2773_v3 = vpop.f32.mrb[17].mxu0 }
 0x47e   :  { %v1964_v4 = vpop.f32.mrb[18].mxu0 }
 0x47f   :  { %v1967_v5 = vrot.slane %v1962_v2, 4  ;;  %v2774_v6 = vpop.f32.mrb[19].mxu0 }
 0x481   :  { %v1968_v7 = vadd.f32 %v1967_v5, %v1962_v2 }
 0x483   :  { %v1969_v8 = vrot.slane %v1968_v7, 2 }
 0x485   :  { %v1970_v55 = vadd.f32 %v1969_v8, %v1968_v7 }
 0x487   :  { %v1971_v9 = vrot.slane %v1970_v55, 1 }
 0x489   :  { %v1972_v10 = vadd.f32 %v1971_v9, %v1970_v55  ;;  %v2133_v55 = vrot.slane %v3386_v31, %v3336_v60  ;;  %v3092_v60 = vld [vmem:[%s3467_s4 + $0x58] sm:$0xff]  }
 0x48b   :  { %v1973_v14 = vmul.f32 0.125, %v1972_v10 }
 0x48d   :  { %v1974_v15 = vsub.f32 %v1962_v2, %v1973_v14 }
 0x48f   :  { %v1975_v16 = vmul.f32 %v1974_v15, %v1974_v15 }
 0x491   :  { %v1976_v17 = vrot.slane %v1975_v16, 4 }
 0x493   :  { %v1977_v18 = vadd.f32 %v1976_v17, %v1975_v16  ;;  %v3089_v16 = vld [vmem:[%s3467_s4 + $0x40] sm:$0xff]   ;;  %v3090_v17 = vld [vmem:[%s3467_s4 + $0x48] sm:$0xff]  }
 0x495   :  { %v1978_v19 = vrot.slane %v1977_v18, 2 }
 0x497   :  { %v1979_v20 = vadd.f32 %v1978_v19, %v1977_v18  ;;  %v2156_v18 = vrot.slane %v3386_v31, %v3339_v61 }
 0x499   :  { %v1980_v21 = vrot.slane %v1979_v20, 1 }
 0x49b   :  { %v1981_v22 = vadd.f32 %v1980_v21, %v1979_v20 }
 0x49d   :  { %v1982_v23 = vmul.f32 0.125, %v1981_v22 }
 0x49f   :  { %v1983_v26 = vadd.f32 1e-05, %v1982_v23 }
 0x4a1   :  { %3105 = vrsqrt.f32 %v1983_v26 }
 0x4ab   :  { %v3106_v32 = vpop.eup %3105 }
 0x4ac   :  { %v1985_v13 = vmul.f32 %v3106_v32, %v3386_v31 }
 0x4ae   :  { %v1989_v24 = vrot.slane %v1985_v13, %v3258_v12  ;;  %v3082_v12 = vld [vmem:[%s3467_s4 + $0x8] sm:$0xff]  }
 0x4af   :  { %2798 = vmatpush3.bf16.msra.mxu0 %v3082_v12 }
 0x4b0   :  { %v1990_v29 = vmul.f32 %v1989_v24, %v1974_v15  ;;  %2799 = vmatprep.subr.bf16.mxu0 %v3168_v41 }
 0x4b2   :  { %v1995_v30 = vadd.f32 %v1994_v28, %v1990_v29 }
 0x4b3   :  { %2800 = vmatpush3.bf16.msra.mxu0 %v3083_v25 }
 0x4b4   :  { %v1996_v33 = vmax.f32 %v1995_v30, 0.0  ;;  %2801 = vmatprep.subr.bf16.mxu0 %v3168_v41 }
 0x4b6   :  { %v2013_v34 = vpack.c.bf16 %v1996_v33, %v1996_v33 }
 0x4b7   :  { %2802 = vmatpush3.bf16.msra.mxu0 %v3084_v37 }
 0x4b8   :  { %2792 = vmatmul.mubr.bf16.vlgmr.msra.gmra.mrb[16].mxu1 %v2013_v34  ;;  %2803 = vmatprep.subr.bf16.mxu0 %v3168_v41 }
 0x4b9   :  { %2823 = vmatprep.mubr.msk.bf16.mxu1 %vm3169_vm0, %v3168_v41  ;;  %2816 = vmatpush3.bf16.msra.mxu1 %v3089_v16 }
 0x4ba   :  { %2817 = vmatprep.subr.bf16.mxu1 %v3168_v41 }
 0x4bb   :  { %2804 = vmatpush3.bf16.msra.mxu0 %v3085_v38 }
 0x4bc   :  { %2805 = vmatprep.subr.bf16.mxu0 %v3168_v41 }
 0x4bd   :  { %2818 = vmatpush3.bf16.msra.mxu1 %v3090_v17 }
 0x4be   :  { %2819 = vmatprep.subr.bf16.mxu1 %v3168_v41 }
 0x4bf   :  { %2806 = vmatpush3.bf16.msra.mxu0 %v3086_v39 }
 0x4c0   :  { %2807 = vmatprep.subr.bf16.mxu0 %v3168_v41 }
 0x4c3   :  { %2808 = vmatpush3.bf16.msra.mxu0 %v3087_v40 }
 0x4c4   :  { %2809 = vmatprep.subr.bf16.mxu0 %v3168_v41 }
 0x4c7   :  { %2810 = vmatpush3.bf16.msra.mxu0 %v3088_v42 }
 0x58b   :  { %v2100_v44 = vpop.f32.mrb[16].mxu1 }
 0x58c   :  { %v2101_v45 = vadd.f32 %v2100_v44, %v2017_v43  ;;  %v2793_v46 = vpop.f32.mrb[17].mxu1 }
 0x58d   :  { %v2103_v47 = vpop.f32.mrb[18].mxu1 }
 0x58e   :  { %v2106_v49 = vrot.slane %v2101_v45, 4  ;;  %v2794_v50 = vpop.f32.mrb[19].mxu1 }
 0x590   :  { %v2107_v51 = vadd.f32 %v2106_v49, %v2101_v45 }
 0x592   :  { %v2108_v52 = vrot.slane %v2107_v51, 2 }
 0x594   :  { %v2109_v53 = vadd.f32 %v2108_v52, %v2107_v51  ;;  %v2568_v52 = vld [vmem:[%s3468_s5 + $0x30] ss:$0 sm:$0xff] }
 0x596   :  { %v2110_v54 = vrot.slane %v2109_v53, 1 }
 0x598   :  { %v2111_v56 = vadd.f32 %v2110_v54, %v2109_v53 }
 0x59a   :  { %v2112_v57 = vmul.f32 0.125, %v2111_v56 }
 0x59c   :  { %v2113_v0 = vsub.f32 %v2101_v45, %v2112_v57  ;;  %v2275_v45 = vrot.slane %v3386_v31, %v1877_v62 }
 0x59e   :  { %v2114_v58 = vmul.f32 %v2113_v0, %v2113_v0 }
 0x5a0   :  { %v2115_v59 = vrot.slane %v2114_v58, 4 }
 0x5a2   :  { %v2116_v63 = vadd.f32 %v2115_v59, %v2114_v58 }
 0x5a4   :  { %v2117_v1 = vrot.slane %v2116_v63, 2 }
 0x5a6   :  { %v2118_v2 = vadd.f32 %v2117_v1, %v2116_v63 }
 0x5a8   :  { %v2119_v3 = vrot.slane %v2118_v2, 1 }
 0x5aa   :  { %v2120_v27 = vadd.f32 %v2119_v3, %v2118_v2 }
 0x5ac   :  { %v2121_v4 = vmul.f32 0.125, %v2120_v27 }
 0x5ae   :  { %v2122_v5 = vadd.f32 1e-05, %v2121_v4 }
 0x5b0   :  { %3107 = vrsqrt.f32 %v2122_v5 }
 0x5ba   :  { %v3108_v6 = vpop.eup %3107 }
 0x5bb   :  { %v2124_v7 = vmul.f32 %v3108_v6, %v3386_v31 }
 0x5bd   :  { %v2128_v8 = vrot.slane %v2124_v7, %v3327_v48  ;;  %v3091_v48 = vld [vmem:[%s3467_s4 + $0x50] sm:$0xff]  }
 0x5be   :  { %2820 = vmatpush3.bf16.msra.mxu1 %v3091_v48 }
 0x5bf   :  { %v2129_v9 = vmul.f32 %v2128_v8, %v2113_v0  ;;  %2821 = vmatprep.subr.bf16.mxu1 %v3168_v41 }
 0x5c1   :  { %v2134_v10 = vadd.f32 %v2133_v55, %v2129_v9 }
 0x5c2   :  { %2822 = vmatpush3.bf16.msra.mxu1 %v3092_v60 }
 0x5c3   :  { %v2135_v14 = vmax.f32 %v2134_v10, 0.0 }
 0x5c5   :  { %v2152_v15 = vpack.c.bf16 %v2135_v14, %v2135_v14 }
 0x5c7   :  { %2812 = vmatmul.mubr.bf16.vlgmr.msra.gmra.mrb[20].mxu0 %v2152_v15 }
 0x69a   :  { %v2239_v19 = vpop.f32.mrb[20].mxu0 }
 0x69b   :  { %v2240_v20 = vadd.f32 %v2239_v19, %v2156_v18  ;;  %v2813_v21 = vpop.f32.mrb[21].mxu0 }
 0x69c   :  { %v2242_v22 = vpop.f32.mrb[22].mxu0 }
 0x69d   :  { %v2246_v23 = vsel %vm2245_vm2, %v2240_v20, 0.0  ;;  %v2814_v26 = vpop.f32.mrb[23].mxu0 }
 0x69e   :  { %v2247_v32 = vrot.slane %v2246_v23, 4 }
 0x6a0   :  { %v2248_v13 = vadd.f32 %v2247_v32, %v2246_v23 }
 0x6a2   :  { %v2249_v24 = vrot.slane %v2248_v13, 2 }
 0x6a4   :  { %v2250_v41 = vadd.f32 %v2249_v24, %v2248_v13 }
 0x6a6   :  { %v2251_v28 = vrot.slane %v2250_v41, 1 }
 0x6a8   :  { %v2252_v29 = vadd.f32 %v2251_v28, %v2250_v41 }
 0x6aa   :  { %v2253_v30 = vmul.f32 0.125, %v2252_v29 }
 0x6ac   :  { %v2254_v33 = vsub.f32 %v2240_v20, %v2253_v30 }
 0x6ae   :  { %v2255_v34 = vmul.f32 %v2254_v33, %v2254_v33 }
 0x6b0   :  { %v2256_v36 = vsel %vm2245_vm2, %v2255_v34, 0.0 }
 0x6b1   :  { %v2257_v61 = vrot.slane %v2256_v36, 4 }
 0x6b3   :  { %v2258_v12 = vadd.f32 %v2257_v61, %v2256_v36 }
 0x6b5   :  { %v2259_v25 = vrot.slane %v2258_v12, 2 }
 0x6b7   :  { %v2260_v37 = vadd.f32 %v2259_v25, %v2258_v12 }
 0x6b9   :  { %v2261_v38 = vrot.slane %v2260_v37, 1 }
 0x6bb   :  { %v2262_v39 = vadd.f32 %v2261_v38, %v2260_v37 }
 0x6bd   :  { %v2263_v40 = vmul.f32 0.125, %v2262_v39 }
 0x6bf   :  { %v2264_v42 = vadd.f32 1e-05, %v2263_v40 }
 0x6c1   :  { %3109 = vrsqrt.f32 %v2264_v42 }
 0x6cb   :  { %v3110_v43 = vpop.eup %3109 }
 0x6cc   :  { %v2266_v44 = vmul.f32 %v3110_v43, %v3386_v31 }
 0x6ce   :  { %v2270_v46 = vrot.slane %v2266_v44, %v1631_v35 }
 0x6d0   :  { %v2271_v47 = vmul.f32 %v2270_v46, %v2254_v33 }
 0x6d2   :  { %v2276_v49 = vadd.f32 %v2275_v45, %v2271_v47 }
 0x6d4   :  { %v2277_v50 = vmax.f32 %v2276_v49, 0.0 }
 0x6d6   :  { %v2286_v51 = vpack.c.bf16 %v2277_v50, %v2277_v50 }
 0x6d8   :  { %2824 = vmatmul.mubr.msk.bf16.vlgmr.msra.gmra.mrb[20].mxu1 %vm2245_vm2, %v2286_v51 }
 0x7ab   :  { %v2348_v53 = vpop.f32.mrb[20].mxu1 }
 0x7ac   :  { %v2358_v54 = vadd.f32 %v2568_v52, %v2348_v53  ;;  %v2825_v56 = vpop.f32.mrb[21].mxu1 }
 0x7ad   :  { %v2351_v57 = vpop.f32.mrb[22].mxu1 }
 0x7ae   :  { %2360 = vst.msk [vmem:[%s3469_s6] sm:$0xff] %vm2359_vm3, %v2358_v54  ;;  %v2826_v11 = vpop.f32.mrb[23].mxu1 }
 0x7af   :  { %2365 = vsyncpa [#allocation4], 1 }
 0x7b0   :  { %2366 = vsyncpa [#allocation6], 1 }

</bundles_post_ra>
